<compile_context>
chip_gen: v7x
topology: tpu7x:2x2x1
jax: 0.10.0
libtpu: 0.0.40
codegen_flags: <defaults>
</compile_context>

<pallas_src>
import functools
import math

import jax
import jax.numpy as jnp
import numpy as np
from jax.experimental import pallas as pl
from jax.experimental.pallas import tpu as pltpu


# ---------------------------------------------------------------- helpers ---
def _layer_norm(h, w, b, eps=1e-5):
    mu = jnp.mean(h, axis=-1, keepdims=True)
    var = jnp.mean(jnp.square(h - mu), axis=-1, keepdims=True)
    return (h - mu) * jax.lax.rsqrt(var + eps) * w + b


def _gelu_exact(x):
    # PyTorch nn.GELU() default (approximate='none'): 0.5*x*(1+erf(x/sqrt(2)))
    return 0.5 * x * (1.0 + jax.lax.erf(x * (1.0 / math.sqrt(2.0))))


def _gelu(x, exact):
    if exact:
        return _gelu_exact(x)
    return jax.nn.gelu(x, approximate=True)


def _vmem_cap_bytes():
    """Generation-aware VMEM cap (v7x only has 64 MiB per TensorCore)."""
    try:
        return int(0.85 * pltpu.get_tpu_info().vmem_capacity_bytes)
    except Exception:
        return 48 << 20          # conservative: fits every generation


# ----------------------------------------------------- capability probes ----
def _erf_probe_kernel(x_ref, o_ref):
    o_ref[...] = jax.lax.erf(x_ref[...])


def _exact_gelu_available():
    """Probe (tiny standalone kernel) whether lax.erf lowers on this Mosaic build.

    Keeps the exact-vs-tanh GELU decision out of the transformer kernel's
    execution path.  NOTE: any probe failure silently selects the tanh
    approximation, which differs slightly from torch nn.GELU(approximate='none').
    """
    try:
        x = jnp.linspace(-3.0, 3.0, 8 * 128, dtype=jnp.float32).reshape(8, 128)
        out = pl.pallas_call(
            _erf_probe_kernel,
            out_shape=jax.ShapeDtypeStruct((8, 128), jnp.float32),
            in_specs=[pl.BlockSpec(memory_space=pltpu.MemorySpace.VMEM)],
            out_specs=pl.BlockSpec(memory_space=pltpu.MemorySpace.VMEM),
        )(x)
        jax.block_until_ready(out)
        return True
    except Exception:
        return False


def _single_buffer_probe_kernel(x_ref, w_ref, o_ref):
    o_ref[...] = x_ref[...] + w_ref[...]


def _single_buffered_weights_available():
    """Probe pipeline_mode=pl.Buffered(1) on a constant-index ("weight") input.

    Single-buffering the VMEM-resident weights halves their footprint (Pallas
    double-buffers every input by default).  Fall back cleanly if this Pallas
    build rejects buffer_count=1.
    """
    try:
        x = jnp.ones((2, 8, 128), jnp.float32)
        w = jnp.full((8, 128), 2.0, jnp.float32)
        out = pl.pallas_call(
            _single_buffer_probe_kernel,
            out_shape=jax.ShapeDtypeStruct((2, 8, 128), jnp.float32),
            grid_spec=pltpu.PrefetchScalarGridSpec(
                num_scalar_prefetch=0,
                grid=(2,),
                in_specs=[pl.BlockSpec((1, 8, 128), lambda i: (i, 0, 0)),
                          pl.BlockSpec((8, 128), lambda i: (0, 0),
                                       pipeline_mode=pl.Buffered(1))],
                out_specs=pl.BlockSpec((1, 8, 128), lambda i: (i, 0, 0))),
            compiler_params=pltpu.CompilerParams(
                dimension_semantics=("parallel",)),
        )(x, w)
        jax.block_until_ready(out)
        return bool(np.allclose(np.asarray(out), 3.0))
    except Exception:
        return False


# ----------------------------------------------------------------- kernel ---
def _block_kernel(x_ref,
                  ln1_w, ln1_b, w_qkv, b_qkv, w_out, b_out,
                  ln2_w, ln2_b, w_fc, b_fc, w_proj, b_proj,
                  o_ref, *, num_heads, exact_gelu):
    # x_ref: (NB, L, D) -- NB full sequences per grid step.
    NB, L, D = x_ref.shape
    H = num_heads
    hd = D // H
    scale = 1.0 / math.sqrt(hd)
    T = NB * L

    x = x_ref[...].astype(jnp.float32).reshape(T, D)

    # ---- attention branch: x + out_proj(MHA(LN1(x))) ----
    h1 = _layer_norm(x, ln1_w[...], ln1_b[...])
    # fused QKV projection: one bf16 MXU matmul, f32 accumulation
    qkv = jnp.dot(h1.astype(jnp.bfloat16), w_qkv[...],
                  preferred_element_type=jnp.float32) + b_qkv[...]

    def _split_heads(t):                       # (T, D) -> (NB*H, L, hd)
        t = jnp.transpose(t.reshape(NB, L, H, hd), (0, 2, 1, 3))
        return t.reshape(NB * H, L, hd)

    # D-aligned slices only (no per-head hd-wide lane slices)
    q = _split_heads(qkv[:, 0 * D:1 * D] * scale).astype(jnp.bfloat16)
    k = _split_heads(qkv[:, 1 * D:2 * D]).astype(jnp.bfloat16)
    v = _split_heads(qkv[:, 2 * D:3 * D]).astype(jnp.bfloat16)

    # TODO(synk): for very long sequences switch to an online-softmax /
    # flash-style KV tiling instead of materializing (NB*H, L, L) scores.
    s = jnp.einsum('bqd,bkd->bqk', q, k,
                   preferred_element_type=jnp.float32)          # (NB*H, L, L)
    s = s - jnp.max(s, axis=-1, keepdims=True)
    e = jnp.exp(s)
    denom = jnp.sum(e, axis=-1, keepdims=True)                  # (NB*H, L, 1)
    ctx = jnp.einsum('bqk,bkd->bqd', e.astype(jnp.bfloat16), v,
                     preferred_element_type=jnp.float32)        # (NB*H, L, hd)
    # normalize after PV: scales the small (L, hd) context, not the (L, L) probs
    ctx = ctx * pl.reciprocal(denom, approx=True)

    # merge heads back to a lane-dense (T, D) tensor, entirely in registers
    ctx = jnp.transpose(ctx.reshape(NB, H, L, hd), (0, 2, 1, 3)).reshape(T, D)
    attn = jnp.dot(ctx.astype(jnp.bfloat16), w_out[...],
                   preferred_element_type=jnp.float32) + b_out[...]
    x1 = x + attn

    # ---- MLP branch: x1 + c_proj(gelu(c_fc(LN2(x1)))) ----
    # TODO(synk): at CLIP-L scale on v7x (64 MiB VMEM) K-tile w_fc/w_proj along
    # mlp_width (extra 'arbitrary' grid axis + f32 accumulator scratch).
    h2 = _layer_norm(x1, ln2_w[...], ln2_b[...])
    fc = jnp.dot(h2.astype(jnp.bfloat16), w_fc[...],
                 preferred_element_type=jnp.float32) + b_fc[...]
    if exact_gelu:
        g = _gelu_exact(fc).astype(jnp.bfloat16)         # f32 erf polynomial
    else:
        # tanh-approx GELU in bf16: EUP/VPU process 2x elems per vreg on
        # v6e/v7x (transparently upcast on v5e).
        g = jax.nn.gelu(fc.astype(jnp.bfloat16), approximate=True)
    mlp = jnp.dot(g, w_proj[...],
                  preferred_element_type=jnp.float32) + b_proj[...]

    o_ref[...] = (x1 + mlp).reshape(NB, L, D).astype(o_ref.dtype)


# ---------------------------------------------------------- tiling chooser --
def _choose_batch_tile(N, L, num_heads):
    """Pick NB (sequences per grid step); always a divisor of N.

    Targets T = NB*L >= 256 rows so MXU matmuls are not M-starved, capped by a
    VMEM budget for the (NB*H, L, L) f32 softmax scores, and keeps the grid
    length >= 2 when that still gives >= 128 rows (2-TC sharding on v7x).
    """
    divisors = [d for d in range(1, N + 1) if N % d == 0]
    score_bytes = num_heads * L * L * 4 * 3       # s + e + bf16 probs, per seq
    mem_cap = max(1, (24 << 20) // max(score_bytes, 1))
    nb = None
    for d in divisors:
        if d > mem_cap:
            break
        if d * L >= 256:
            nb = d
            break
    if nb is None:
        nb = max([d for d in divisors if d <= mem_cap] or [1])
    if nb == N and (N % 2 == 0) and ((N // 2) * L >= 128):
        nb = N // 2                               # keep grid >= 2 for megacore
    return nb


# ---------------------------------------------------------- per-layer call --
def _residual_block(x_nld, layer_params, num_heads, exact_gelu, single_buffer_w):
    N, L, D = x_nld.shape
    NB = _choose_batch_tile(N, L, num_heads)
    grid = (N // NB,)
    T = NB * L
    mlp_w = layer_params[8].shape[1]              # w_fc: (D, mlp_width)

    act_spec = pl.BlockSpec((NB, L, D), lambda i: (i, 0, 0))

    def _weight_spec(shape):
        if single_buffer_w:
            # constant index_map -> the block never changes; single-buffer it
            return pl.BlockSpec(shape, lambda i: (0, 0),
                                pipeline_mode=pl.Buffered(1))
        return pl.BlockSpec(shape, lambda i: (0, 0))

    w_specs = [_weight_spec(w.shape) for w in layer_params]

    # --- explicit VMEM budget (weights + pipelined tiles + temporaries) -----
    weight_bytes = sum(int(np.prod(w.shape)) * w.dtype.itemsize
                       for w in layer_params)
    weight_resident = weight_bytes * (1 if single_buffer_w else 2)
    tile_bytes = NB * L * D * x_nld.dtype.itemsize
    temp_bytes = (10 * T * D * 4                         # f32 (T,D) temporaries
                  + 3 * T * D * 2                        # bf16 q/k/v head tensors
                  + 2 * T * mlp_w * 4                    # fc + gelu surfaces
                  + 3 * NB * num_heads * L * L * 4)      # scores / exp / probs
    vmem_limit = int(min(_vmem_cap_bytes(),
                         weight_resident + 4 * tile_bytes + temp_bytes
                         + (16 << 20)))

    # --- advisory cost estimate so XLA schedules the per-layer calls sanely --
    flops = 2 * N * L * D * (4 * D + 2 * mlp_w) + 4 * N * L * L * D
    transcendentals = N * num_heads * L * L + N * L * mlp_w
    bytes_accessed = weight_bytes + 2 * N * L * D * x_nld.dtype.itemsize
    cost = pl.CostEstimate(flops=int(flops),
                           transcendentals=int(transcendentals),
                           bytes_accessed=int(bytes_accessed))

    kernel = functools.partial(_block_kernel, num_heads=num_heads,
                               exact_gelu=exact_gelu)
    # TODO(synk): hide the per-layer weight DMA by prefetching the next layer's
    # weights from the current pallas_call (cross-call DMA + semaphore outputs).
    return pl.pallas_call(
        kernel,
        out_shape=jax.ShapeDtypeStruct((N, L, D), x_nld.dtype),
        grid_spec=pltpu.PrefetchScalarGridSpec(
            num_scalar_prefetch=0,
            grid=grid,
            in_specs=[act_spec] + w_specs,
            out_specs=pl.BlockSpec((NB, L, D), lambda i: (i, 0, 0))),
        compiler_params=pltpu.CompilerParams(
            dimension_semantics=("parallel",),
            vmem_limit_bytes=vmem_limit),
        cost_estimate=cost,
    )(x_nld, *layer_params)


def transformer_forward(x_lnd, params, num_heads, exact_gelu=True,
                        single_buffer_w=False):
    """x_lnd: (L, N, D) like the PyTorch module; attn_mask=None path only."""
    # TODO(synk): optional additive attn_mask not implemented (forward default is None).
    x = jnp.transpose(x_lnd, (1, 0, 2))          # glue: (L,N,D) -> (N,L,D)
    for p in params:
        x = _residual_block(x, p, num_heads, exact_gelu, single_buffer_w)
    return jnp.transpose(x, (1, 0, 2))           # back to (L, N, D)


# ---------------------------------------------------- deterministic params ---
def init_params(key, width, layers, mlp_ratio=4.0):
    mlp_width = int(width * mlp_ratio)
    params = []
    s = 0.02
    for l in range(layers):
        ks = jax.random.split(jax.random.fold_in(key, l), 6)
        ln1_w = jnp.ones((1, width), jnp.float32)
        ln1_b = jnp.zeros((1, width), jnp.float32)
        # fused in_proj: columns ordered [q | k | v] (matches torch in_proj)
        w_qkv = (jax.random.normal(ks[0], (width, 3 * width), jnp.float32) * s
                 ).astype(jnp.bfloat16)
        b_qkv = jax.random.normal(ks[1], (1, 3 * width), jnp.float32) * s
        w_out = (jax.random.normal(ks[2], (width, width), jnp.float32) * s
                 ).astype(jnp.bfloat16)
        b_out = jnp.zeros((1, width), jnp.float32)
        ln2_w = jnp.ones((1, width), jnp.float32)
        ln2_b = jnp.zeros((1, width), jnp.float32)
        w_fc = (jax.random.normal(ks[3], (width, mlp_width), jnp.float32) * s
                ).astype(jnp.bfloat16)
        b_fc = jax.random.normal(ks[4], (1, mlp_width), jnp.float32) * s
        w_proj = (jax.random.normal(ks[5], (mlp_width, width), jnp.float32) * s
                  ).astype(jnp.bfloat16)
        b_proj = jnp.zeros((1, width), jnp.float32)
        params.append((ln1_w, ln1_b, w_qkv, b_qkv, w_out, b_out,
                       ln2_w, ln2_b, w_fc, b_fc, w_proj, b_proj))
    return params


# --------------------------------------------------- pure-JAX reference ----
def _ref_block(x, p, num_heads, exact_gelu):
    (ln1_w, ln1_b, w_qkv, b_qkv, w_out, b_out,
     ln2_w, ln2_b, w_fc, b_fc, w_proj, b_proj) = p
    L, N, D = x.shape
    H = num_heads
    hd = D // H
    f32 = lambda a: a.astype(jnp.float32)

    xf = x.reshape(L * N, D).astype(jnp.float32)
    h1 = _layer_norm(xf, ln1_w, ln1_b)
    qkv = h1 @ f32(w_qkv) + b_qkv
    q, k, v = qkv[:, :D], qkv[:, D:2 * D], qkv[:, 2 * D:]

    def th(t):  # (L*N, D) -> (N, H, L, hd), matching torch MHA reshape
        return jnp.transpose(t.reshape(L, N, H, hd), (1, 2, 0, 3))

    qh, kh, vh = th(q) / math.sqrt(hd), th(k), th(v)
    s = jnp.einsum('nhqd,nhkd->nhqk', qh, kh)
    pr = jax.nn.softmax(s, axis=-1)
    ctx = jnp.einsum('nhqk,nhkd->nhqd', pr, vh)
    ctx = jnp.transpose(ctx, (2, 0, 1, 3)).reshape(L * N, D)
    x1 = xf + ctx @ f32(w_out) + b_out
    h2 = _layer_norm(x1, ln2_w, ln2_b)
    x2 = x1 + _gelu(h2 @ f32(w_fc) + b_fc, exact_gelu) @ f32(w_proj) + b_proj
    return x2.reshape(L, N, D)


def reference_forward(x, params, num_heads, exact_gelu):
    for p in params:
        x = _ref_block(x, p, num_heads, exact_gelu)
    return x


# -------------------------------------------------------------------- main --
if __name__ == "__main__":
    width, layers, heads = 32, 2, 4        # Transformer(width=32, layers=2, heads=4)
    L, N = 8, 2                            # seq_len=8, batch=2

    key = jax.random.PRNGKey(0)
    kx, kp = jax.random.split(key)
    x = jax.random.normal(kx, (L, N, width), jnp.float32)
    params = init_params(kp, width, layers)

    exact = _exact_gelu_available()            # exact erf GELU if it lowers
    single_w = _single_buffered_weights_available()
    out = jax.block_until_ready(
        transformer_forward(x, params, heads, exact_gelu=exact,
                            single_buffer_w=single_w))
    ref = reference_forward(x, params, heads, exact)

    assert out.shape == (L, N, width) and out.dtype == x.dtype
    np.testing.assert_allclose(np.asarray(out), np.asarray(ref),
                               atol=2e-2, rtol=2e-2)
    print("KERNEL_OK")
</pallas_src>

<mosaic_0001>
module attributes {stable_mosaic.version = 11 : i64} {
  func.func @_erf_probe_kernel(%arg0: memref<8x128xf32, #tpu.memory_space<vmem>>, %arg1: memref<8x128xf32, #tpu.memory_space<vmem>>) attributes {dimension_semantics = [], scalar_prefetch = 0 : i64, scratch_operands = 0 : i64, tpu.core_type = #tpu.core_type<tc>} {
    %c0 = arith.constant 0 : index
    %c0_0 = arith.constant 0 : index
    %0 = vector.load %arg0[%c0, %c0_0] : memref<8x128xf32, #tpu.memory_space<vmem>>, vector<8x128xf32>
    %1 = math.erf %0 : vector<8x128xf32>
    %c0_1 = arith.constant 0 : index
    %c0_2 = arith.constant 0 : index
    %2 = vector.load %arg1[%c0_1, %c0_2] : memref<8x128xf32, #tpu.memory_space<vmem>>, vector<8x128xf32>
    tpu.vector_store %arg1[%c0_1, %c0_2], %1 {strides = array<i32>} : memref<8x128xf32, #tpu.memory_space<vmem>>, vector<8x128xf32>,
    return
  }
}

module attributes {stable_mosaic.version = 11 : i64} {
  func.func @_single_buffer_probe_kernel(%arg0: i32, %arg1: memref<1x8x128xf32, #tpu.memory_space<vmem>>, %arg2: memref<8x128xf32, #tpu.memory_space<vmem>>, %arg3: memref<1x8x128xf32, #tpu.memory_space<vmem>>) attributes {dimension_semantics = [#tpu.dimension_semantics<parallel>], iteration_bounds = array<i64: 2>, scalar_prefetch = 0 : i64, scratch_operands = 0 : i64, tpu.core_type = #tpu.core_type<tc>, window_params = [{transform_indices = @transform_0, window_bounds = array<i64: 1, 8, 128>}, {pipeline_mode = #tpu.pipeline_mode<synchronous>, transform_indices = @transform_1, window_bounds = array<i64: 8, 128>}, {transform_indices = @transform_2, window_bounds = array<i64: 1, 8, 128>}]} {
    %c0 = arith.constant 0 : index
    %c0_0 = arith.constant 0 : index
    %c0_1 = arith.constant 0 : index
    %0 = vector.load %arg1[%c0, %c0_0, %c0_1] : memref<1x8x128xf32, #tpu.memory_space<vmem>>, vector<1x8x128xf32>
    %c0_2 = arith.constant 0 : index
    %c0_3 = arith.constant 0 : index
    %1 = vector.load %arg2[%c0_2, %c0_3] : memref<8x128xf32, #tpu.memory_space<vmem>>, vector<8x128xf32>
    %2 = vector.shape_cast %1 : vector<8x128xf32> to vector<1x8x128xf32>
    %3 = arith.addf %0, %2 : vector<1x8x128xf32>
    %c0_4 = arith.constant 0 : index
    %c0_5 = arith.constant 0 : index
    %c0_6 = arith.constant 0 : index
    %4 = vector.load %arg3[%c0_4, %c0_5, %c0_6] : memref<1x8x128xf32, #tpu.memory_space<vmem>>, vector<1x8x128xf32>
    tpu.vector_store %arg3[%c0_4, %c0_5, %c0_6], %3 {strides = array<i32>} : memref<1x8x128xf32, #tpu.memory_space<vmem>>, vector<1x8x128xf32>,
    return
  }
  func.func @transform_0(%arg0: i32) -> (i32, i32, i32) {
    %c0_i32 = arith.constant 0 : i32
    %c0_i32_0 = arith.constant 0 : i32
    %c0_i32_1 = arith.constant 0 : i32
    return %arg0, %c0_i32, %c0_i32_0 : i32, i32, i32
  }
  func.func @transform_1(%arg0: i32) -> (i32, i32) {
    %c0_i32 = arith.constant 0 : i32
    %c0_i32_0 = arith.constant 0 : i32
    %c0_i32_1 = arith.constant 0 : i32
    return %c0_i32, %c0_i32_0 : i32, i32
  }
  func.func @transform_2(%arg0: i32) -> (i32, i32, i32) {
    %c0_i32 = arith.constant 0 : i32
    %c0_i32_0 = arith.constant 0 : i32
    %c0_i32_1 = arith.constant 0 : i32
    return %arg0, %c0_i32, %c0_i32_0 : i32, i32, i32
  }
}

module attributes {stable_mosaic.version = 11 : i64} {
  func.func @_block_kernel(%arg0: i32, %arg1: memref<2x8x32xf32, #tpu.memory_space<vmem>>, %arg2: memref<1x32xf32, #tpu.memory_space<vmem>>, %arg3: memref<1x32xf32, #tpu.memory_space<vmem>>, %arg4: memref<32x96xbf16, #tpu.memory_space<vmem>>, %arg5: memref<1x96xf32, #tpu.memory_space<vmem>>, %arg6: memref<32x32xbf16, #tpu.memory_space<vmem>>, %arg7: memref<1x32xf32, #tpu.memory_space<vmem>>, %arg8: memref<1x32xf32, #tpu.memory_space<vmem>>, %arg9: memref<1x32xf32, #tpu.memory_space<vmem>>, %arg10: memref<32x128xbf16, #tpu.memory_space<vmem>>, %arg11: memref<1x128xf32, #tpu.memory_space<vmem>>, %arg12: memref<128x32xbf16, #tpu.memory_space<vmem>>, %arg13: memref<1x32xf32, #tpu.memory_space<vmem>>, %arg14: memref<2x8x32xf32, #tpu.memory_space<vmem>>) attributes {dimension_semantics = [#tpu.dimension_semantics<parallel>], iteration_bounds = array<i64: 1>, scalar_prefetch = 0 : i64, scratch_operands = 0 : i64, tpu.core_type = #tpu.core_type<tc>, window_params = [{transform_indices = @transform_0, window_bounds = array<i64: 2, 8, 32>}, {pipeline_mode = #tpu.pipeline_mode<synchronous>, transform_indices = @transform_1, window_bounds = array<i64: 1, 32>}, {pipeline_mode = #tpu.pipeline_mode<synchronous>, transform_indices = @transform_2, window_bounds = array<i64: 1, 32>}, {pipeline_mode = #tpu.pipeline_mode<synchronous>, transform_indices = @transform_3, window_bounds = array<i64: 32, 96>}, {pipeline_mode = #tpu.pipeline_mode<synchronous>, transform_indices = @transform_4, window_bounds = array<i64: 1, 96>}, {pipeline_mode = #tpu.pipeline_mode<synchronous>, transform_indices = @transform_5, window_bounds = array<i64: 32, 32>}, {pipeline_mode = #tpu.pipeline_mode<synchronous>, transform_indices = @transform_6, window_bounds = array<i64: 1, 32>}, {pipeline_mode = #tpu.pipeline_mode<synchronous>, transform_indices = @transform_7, window_bounds = array<i64: 1, 32>}, {pipeline_mode = #tpu.pipeline_mode<synchronous>, transform_indices = @transform_8, window_bounds = array<i64: 1, 32>}, {pipeline_mode = #tpu.pipeline_mode<synchronous>, transform_indices = @transform_9, window_bounds = array<i64: 32, 128>}, {pipeline_mode = #tpu.pipeline_mode<synchronous>, transform_indices = @transform_10, window_bounds = array<i64: 1, 128>}, {pipeline_mode = #tpu.pipeline_mode<synchronous>, transform_indices = @transform_11, window_bounds = array<i64: 128, 32>}, {pipeline_mode = #tpu.pipeline_mode<synchronous>, transform_indices = @transform_12, window_bounds = array<i64: 1, 32>}, {transform_indices = @transform_13, window_bounds = array<i64: 2, 8, 32>}]} {
    %c0 = arith.constant 0 : index
    %c0_0 = arith.constant 0 : index
    %c0_1 = arith.constant 0 : index
    %0 = vector.load %arg1[%c0, %c0_0, %c0_1] : memref<2x8x32xf32, #tpu.memory_space<vmem>>, vector<2x8x32xf32>
    %1 = vector.shape_cast %0 : vector<2x8x32xf32> to vector<16x32xf32>
    %c0_2 = arith.constant 0 : index
    %c0_3 = arith.constant 0 : index
    %2 = vector.load %arg2[%c0_2, %c0_3] : memref<1x32xf32, #tpu.memory_space<vmem>>, vector<1x32xf32>
    %c0_4 = arith.constant 0 : index
    %c0_5 = arith.constant 0 : index
    %3 = vector.load %arg3[%c0_4, %c0_5] : memref<1x32xf32, #tpu.memory_space<vmem>>, vector<1x32xf32>
    %cst = arith.constant dense<0.000000e+00> : vector<16xf32>
    %4 = vector.multi_reduction <add>, %1, %cst [1] : vector<16x32xf32> to vector<16xf32>
    %5 = vector.shape_cast %4 : vector<16xf32> to vector<16x1xf32>
    %cst_6 = arith.constant 3.200000e+01 : f32
    %6 = vector.broadcast %cst_6 : f32 to vector<16x1xf32>
    %7 = arith.divf %5, %6 : vector<16x1xf32>
    %8 = vector.broadcast %7 : vector<16x1xf32> to vector<16x32xf32>
    %9 = arith.subf %1, %8 : vector<16x32xf32>
    %10 = arith.mulf %9, %9 : vector<16x32xf32>
    %cst_7 = arith.constant dense<0.000000e+00> : vector<16xf32>
    %11 = vector.multi_reduction <add>, %10, %cst_7 [1] : vector<16x32xf32> to vector<16xf32>
    %12 = vector.shape_cast %11 : vector<16xf32> to vector<16x1xf32>
    %cst_8 = arith.constant 3.200000e+01 : f32
    %13 = vector.broadcast %cst_8 : f32 to vector<16x1xf32>
    %14 = arith.divf %12, %13 : vector<16x1xf32>
    %15 = vector.broadcast %7 : vector<16x1xf32> to vector<16x32xf32>
    %16 = arith.subf %1, %15 : vector<16x32xf32>
    %cst_9 = arith.constant 9.99999974E-6 : f32
    %17 = vector.broadcast %cst_9 : f32 to vector<16x1xf32>
    %18 = arith.addf %14, %17 : vector<16x1xf32>
    %19 = math.rsqrt %18 : vector<16x1xf32>
    %20 = vector.broadcast %19 : vector<16x1xf32> to vector<16x32xf32>
    %21 = arith.mulf %16, %20 : vector<16x32xf32>
    %22 = vector.broadcast %2 : vector<1x32xf32> to vector<16x32xf32>
    %23 = arith.mulf %21, %22 : vector<16x32xf32>
    %24 = vector.broadcast %3 : vector<1x32xf32> to vector<16x32xf32>
    %25 = arith.addf %23, %24 : vector<16x32xf32>
    %26 = arith.truncf %25 : vector<16x32xf32> to vector<16x32xbf16>
    %c0_10 = arith.constant 0 : index
    %c0_11 = arith.constant 0 : index
    %27 = vector.load %arg4[%c0_10, %c0_11] : memref<32x96xbf16, #tpu.memory_space<vmem>>, vector<32x96xbf16>
    %cst_12 = arith.constant dense<0.000000e+00> : vector<16x96xf32>
    %28 = tpu.matmul %26, %27, %cst_12 {dimension_numbers = #tpu.dot_dimension_numbers<[1], [0], [0], [1], [0, 0, 1, 1], [], []>} : vector<16x32xbf16>, vector<32x96xbf16>, vector<16x96xf32> -> vector<16x96xf32>
    %c0_13 = arith.constant 0 : index
    %c0_14 = arith.constant 0 : index
    %29 = vector.load %arg5[%c0_13, %c0_14] : memref<1x96xf32, #tpu.memory_space<vmem>>, vector<1x96xf32>
    %30 = vector.broadcast %29 : vector<1x96xf32> to vector<16x96xf32>
    %31 = arith.addf %28, %30 : vector<16x96xf32>
    %32 = vector.extract_strided_slice %31 {offsets = [0, 0], sizes = [16, 32], strides = [1, 1]} : vector<16x96xf32> to vector<16x32xf32>
    %cst_15 = arith.constant 0.353553385 : f32
    %33 = vector.broadcast %cst_15 : f32 to vector<16x32xf32>
    %34 = arith.mulf %32, %33 : vector<16x32xf32>
    %35 = vector.shape_cast %34 : vector<16x32xf32> to vector<2x8x4x8xf32>
    %36 = tpu.transpose %35, [0, 2, 1, 3] : vector<2x8x4x8xf32> -> vector<2x4x8x8xf32>
    %37 = vector.shape_cast %36 : vector<2x4x8x8xf32> to vector<8x8x8xf32>
    %38 = arith.truncf %37 : vector<8x8x8xf32> to vector<8x8x8xbf16>
    %39 = vector.extract_strided_slice %31 {offsets = [0, 32], sizes = [16, 32], strides = [1, 1]} : vector<16x96xf32> to vector<16x32xf32>
    %40 = vector.shape_cast %39 : vector<16x32xf32> to vector<2x8x4x8xf32>
    %41 = tpu.transpose %40, [0, 2, 1, 3] : vector<2x8x4x8xf32> -> vector<2x4x8x8xf32>
    %42 = vector.shape_cast %41 : vector<2x4x8x8xf32> to vector<8x8x8xf32>
    %43 = arith.truncf %42 : vector<8x8x8xf32> to vector<8x8x8xbf16>
    %44 = vector.extract_strided_slice %31 {offsets = [0, 64], sizes = [16, 32], strides = [1, 1]} : vector<16x96xf32> to vector<16x32xf32>
    %45 = vector.shape_cast %44 : vector<16x32xf32> to vector<2x8x4x8xf32>
    %46 = tpu.transpose %45, [0, 2, 1, 3] : vector<2x8x4x8xf32> -> vector<2x4x8x8xf32>
    %47 = vector.shape_cast %46 : vector<2x4x8x8xf32> to vector<8x8x8xf32>
    %48 = arith.truncf %47 : vector<8x8x8xf32> to vector<8x8x8xbf16>
    "tpu.trace_start"() <{level = 10 : i32, message = "bqd,bkd->bqk"}> : () -> ()
    %cst_16 = arith.constant dense<0.000000e+00> : vector<8x8x8xf32>
    %49 = tpu.matmul %38, %43, %cst_16 {dimension_numbers = #tpu.dot_dimension_numbers<[2], [2], [1], [1], [0, 0, 0, 1, 1, 1], [0], [0]>} : vector<8x8x8xbf16>, vector<8x8x8xbf16>, vector<8x8x8xf32> -> vector<8x8x8xf32>
    "tpu.trace_stop"() : () -> ()
    %cst_17 = arith.constant dense<0xFF800000> : vector<8x8xf32>
    %50 = vector.multi_reduction <maximumf>, %49, %cst_17 [2] : vector<8x8x8xf32> to vector<8x8xf32>
    %51 = vector.shape_cast %50 : vector<8x8xf32> to vector<8x8x1xf32>
    %52 = vector.broadcast %51 : vector<8x8x1xf32> to vector<8x8x8xf32>
    %53 = arith.subf %49, %52 : vector<8x8x8xf32>
    %54 = math.exp %53 : vector<8x8x8xf32>
    %cst_18 = arith.constant dense<0.000000e+00> : vector<8x8xf32>
    %55 = vector.multi_reduction <add>, %54, %cst_18 [2] : vector<8x8x8xf32> to vector<8x8xf32>
    %56 = vector.shape_cast %55 : vector<8x8xf32> to vector<8x8x1xf32>
    %57 = arith.truncf %54 : vector<8x8x8xf32> to vector<8x8x8xbf16>
    "tpu.trace_start"() <{level = 10 : i32, message = "bqk,bkd->bqd"}> : () -> ()
    %cst_19 = arith.constant dense<0.000000e+00> : vector<8x8x8xf32>
    %58 = tpu.matmul %57, %48, %cst_19 {dimension_numbers = #tpu.dot_dimension_numbers<[2], [1], [1], [2], [0, 0, 0, 1, 1, 2], [0], [0]>} : vector<8x8x8xbf16>, vector<8x8x8xbf16>, vector<8x8x8xf32> -> vector<8x8x8xf32>
    "tpu.trace_stop"() : () -> ()
    %59 = tpu.reciprocal %56 {approx = true} : vector<8x8x1xf32> -> vector<8x8x1xf32>
    %60 = vector.broadcast %59 : vector<8x8x1xf32> to vector<8x8x8xf32>
    %61 = arith.mulf %58, %60 : vector<8x8x8xf32>
    %62 = vector.shape_cast %61 : vector<8x8x8xf32> to vector<2x4x8x8xf32>
    %63 = tpu.transpose %62, [0, 2, 1, 3] : vector<2x4x8x8xf32> -> vector<2x8x4x8xf32>
    %64 = vector.shape_cast %63 : vector<2x8x4x8xf32> to vector<16x32xf32>
    %65 = arith.truncf %64 : vector<16x32xf32> to vector<16x32xbf16>
    %c0_20 = arith.constant 0 : index
    %c0_21 = arith.constant 0 : index
    %66 = vector.load %arg6[%c0_20, %c0_21] : memref<32x32xbf16, #tpu.memory_space<vmem>>, vector<32x32xbf16>
    %cst_22 = arith.constant dense<0.000000e+00> : vector<16x32xf32>
    %67 = tpu.matmul %65, %66, %cst_22 {dimension_numbers = #tpu.dot_dimension_numbers<[1], [0], [0], [1], [0, 0, 1, 1], [], []>} : vector<16x32xbf16>, vector<32x32xbf16>, vector<16x32xf32> -> vector<16x32xf32>
    %c0_23 = arith.constant 0 : index
    %c0_24 = arith.constant 0 : index
    %68 = vector.load %arg7[%c0_23, %c0_24] : memref<1x32xf32, #tpu.memory_space<vmem>>, vector<1x32xf32>
    %69 = vector.broadcast %68 : vector<1x32xf32> to vector<16x32xf32>
    %70 = arith.addf %67, %69 : vector<16x32xf32>
    %71 = arith.addf %1, %70 : vector<16x32xf32>
    %c0_25 = arith.constant 0 : index
    %c0_26 = arith.constant 0 : index
    %72 = vector.load %arg8[%c0_25, %c0_26] : memref<1x32xf32, #tpu.memory_space<vmem>>, vector<1x32xf32>
    %c0_27 = arith.constant 0 : index
    %c0_28 = arith.constant 0 : index
    %73 = vector.load %arg9[%c0_27, %c0_28] : memref<1x32xf32, #tpu.memory_space<vmem>>, vector<1x32xf32>
    %cst_29 = arith.constant dense<0.000000e+00> : vector<16xf32>
    %74 = vector.multi_reduction <add>, %71, %cst_29 [1] : vector<16x32xf32> to vector<16xf32>
    %75 = vector.shape_cast %74 : vector<16xf32> to vector<16x1xf32>
    %cst_30 = arith.constant 3.200000e+01 : f32
    %76 = vector.broadcast %cst_30 : f32 to vector<16x1xf32>
    %77 = arith.divf %75, %76 : vector<16x1xf32>
    %78 = vector.broadcast %77 : vector<16x1xf32> to vector<16x32xf32>
    %79 = arith.subf %71, %78 : vector<16x32xf32>
    %80 = arith.mulf %79, %79 : vector<16x32xf32>
    %cst_31 = arith.constant dense<0.000000e+00> : vector<16xf32>
    %81 = vector.multi_reduction <add>, %80, %cst_31 [1] : vector<16x32xf32> to vector<16xf32>
    %82 = vector.shape_cast %81 : vector<16xf32> to vector<16x1xf32>
    %cst_32 = arith.constant 3.200000e+01 : f32
    %83 = vector.broadcast %cst_32 : f32 to vector<16x1xf32>
    %84 = arith.divf %82, %83 : vector<16x1xf32>
    %85 = vector.broadcast %77 : vector<16x1xf32> to vector<16x32xf32>
    %86 = arith.subf %71, %85 : vector<16x32xf32>
    %cst_33 = arith.constant 9.99999974E-6 : f32
    %87 = vector.broadcast %cst_33 : f32 to vector<16x1xf32>
    %88 = arith.addf %84, %87 : vector<16x1xf32>
    %89 = math.rsqrt %88 : vector<16x1xf32>
    %90 = vector.broadcast %89 : vector<16x1xf32> to vector<16x32xf32>
    %91 = arith.mulf %86, %90 : vector<16x32xf32>
    %92 = vector.broadcast %72 : vector<1x32xf32> to vector<16x32xf32>
    %93 = arith.mulf %91, %92 : vector<16x32xf32>
    %94 = vector.broadcast %73 : vector<1x32xf32> to vector<16x32xf32>
    %95 = arith.addf %93, %94 : vector<16x32xf32>
    %96 = arith.truncf %95 : vector<16x32xf32> to vector<16x32xbf16>
    %c0_34 = arith.constant 0 : index
    %c0_35 = arith.constant 0 : index
    %97 = vector.load %arg10[%c0_34, %c0_35] : memref<32x128xbf16, #tpu.memory_space<vmem>>, vector<32x128xbf16>
    %cst_36 = arith.constant dense<0.000000e+00> : vector<16x128xf32>
    %98 = tpu.matmul %96, %97, %cst_36 {dimension_numbers = #tpu.dot_dimension_numbers<[1], [0], [0], [1], [0, 0, 1, 1], [], []>} : vector<16x32xbf16>, vector<32x128xbf16>, vector<16x128xf32> -> vector<16x128xf32>
    %c0_37 = arith.constant 0 : index
    %c0_38 = arith.constant 0 : index
    %99 = vector.load %arg11[%c0_37, %c0_38] : memref<1x128xf32, #tpu.memory_space<vmem>>, vector<1x128xf32>
    %100 = vector.broadcast %99 : vector<1x128xf32> to vector<16x128xf32>
    %101 = arith.addf %98, %100 : vector<16x128xf32>
    %102 = arith.truncf %101 : vector<16x128xf32> to vector<16x128xbf16>
    %103 = arith.mulf %102, %102 : vector<16x128xbf16>
    %104 = arith.mulf %102, %103 : vector<16x128xbf16>
    %cst_39 = arith.constant 4.467770e-02 : bf16
    %105 = vector.broadcast %cst_39 : bf16 to vector<16x128xbf16>
    %106 = arith.mulf %105, %104 : vector<16x128xbf16>
    %107 = arith.addf %102, %106 : vector<16x128xbf16>
    %cst_40 = arith.constant 7.968750e-01 : bf16
    %108 = vector.broadcast %cst_40 : bf16 to vector<16x128xbf16>
    %109 = arith.mulf %108, %107 : vector<16x128xbf16>
    %110 = math.tanh %109 : vector<16x128xbf16>
    %cst_41 = arith.constant 1.000000e+00 : bf16
    %111 = vector.broadcast %cst_41 : bf16 to vector<16x128xbf16>
    %112 = arith.addf %111, %110 : vector<16x128xbf16>
    %cst_42 = arith.constant 5.000000e-01 : bf16
    %113 = vector.broadcast %cst_42 : bf16 to vector<16x128xbf16>
    %114 = arith.mulf %113, %112 : vector<16x128xbf16>
    %115 = arith.mulf %102, %114 : vector<16x128xbf16>
    %c0_43 = arith.constant 0 : index
    %c0_44 = arith.constant 0 : index
    %116 = vector.load %arg12[%c0_43, %c0_44] : memref<128x32xbf16, #tpu.memory_space<vmem>>, vector<128x32xbf16>
    %cst_45 = arith.constant dense<0.000000e+00> : vector<16x32xf32>
    %117 = tpu.matmul %115, %116, %cst_45 {dimension_numbers = #tpu.dot_dimension_numbers<[1], [0], [0], [1], [0, 0, 1, 1], [], []>} : vector<16x128xbf16>, vector<128x32xbf16>, vector<16x32xf32> -> vector<16x32xf32>
    %c0_46 = arith.constant 0 : index
    %c0_47 = arith.constant 0 : index
    %118 = vector.load %arg13[%c0_46, %c0_47] : memref<1x32xf32, #tpu.memory_space<vmem>>, vector<1x32xf32>
    %119 = vector.broadcast %118 : vector<1x32xf32> to vector<16x32xf32>
    %120 = arith.addf %117, %119 : vector<16x32xf32>
    %121 = arith.addf %71, %120 : vector<16x32xf32>
    %122 = vector.shape_cast %121 : vector<16x32xf32> to vector<2x8x32xf32>
    %c0_48 = arith.constant 0 : index
    %c0_49 = arith.constant 0 : index
    %c0_50 = arith.constant 0 : index
    %123 = vector.load %arg14[%c0_48, %c0_49, %c0_50] : memref<2x8x32xf32, #tpu.memory_space<vmem>>, vector<2x8x32xf32>
    tpu.vector_store %arg14[%c0_48, %c0_49, %c0_50], %122 {strides = array<i32>} : memref<2x8x32xf32, #tpu.memory_space<vmem>>, vector<2x8x32xf32>,
    return
  }
  func.func @transform_0(%arg0: i32) -> (i32, i32, i32) {
    %c0_i32 = arith.constant 0 : i32
    %c0_i32_0 = arith.constant 0 : i32
    %c0_i32_1 = arith.constant 0 : i32
    return %arg0, %c0_i32, %c0_i32_0 : i32, i32, i32
  }
  func.func @transform_1(%arg0: i32) -> (i32, i32) {
    %c0_i32 = arith.constant 0 : i32
    %c0_i32_0 = arith.constant 0 : i32
    %c0_i32_1 = arith.constant 0 : i32
    return %c0_i32, %c0_i32_0 : i32, i32
  }
  func.func @transform_2(%arg0: i32) -> (i32, i32) {
    %c0_i32 = arith.constant 0 : i32
    %c0_i32_0 = arith.constant 0 : i32
    %c0_i32_1 = arith.constant 0 : i32
    return %c0_i32, %c0_i32_0 : i32, i32
  }
  func.func @transform_3(%arg0: i32) -> (i32, i32) {
    %c0_i32 = arith.constant 0 : i32
    %c0_i32_0 = arith.constant 0 : i32
    %c0_i32_1 = arith.constant 0 : i32
    return %c0_i32, %c0_i32_0 : i32, i32
  }
  func.func @transform_4(%arg0: i32) -> (i32, i32) {
    %c0_i32 = arith.constant 0 : i32
    %c0_i32_0 = arith.constant 0 : i32
    %c0_i32_1 = arith.constant 0 : i32
    return %c0_i32, %c0_i32_0 : i32, i32
  }
  func.func @transform_5(%arg0: i32) -> (i32, i32) {
    %c0_i32 = arith.constant 0 : i32
    %c0_i32_0 = arith.constant 0 : i32
    %c0_i32_1 = arith.constant 0 : i32
    return %c0_i32, %c0_i32_0 : i32, i32
  }
  func.func @transform_6(%arg0: i32) -> (i32, i32) {
    %c0_i32 = arith.constant 0 : i32
    %c0_i32_0 = arith.constant 0 : i32
    %c0_i32_1 = arith.constant 0 : i32
    return %c0_i32, %c0_i32_0 : i32, i32
  }
  func.func @transform_7(%arg0: i32) -> (i32, i32) {
    %c0_i32 = arith.constant 0 : i32
    %c0_i32_0 = arith.constant 0 : i32
    %c0_i32_1 = arith.constant 0 : i32
    return %c0_i32, %c0_i32_0 : i32, i32
  }
  func.func @transform_8(%arg0: i32) -> (i32, i32) {
    %c0_i32 = arith.constant 0 : i32
    %c0_i32_0 = arith.constant 0 : i32
    %c0_i32_1 = arith.constant 0 : i32
    return %c0_i32, %c0_i32_0 : i32, i32
  }
  func.func @transform_9(%arg0: i32) -> (i32, i32) {
    %c0_i32 = arith.constant 0 : i32
    %c0_i32_0 = arith.constant 0 : i32
    %c0_i32_1 = arith.constant 0 : i32
    return %c0_i32, %c0_i32_0 : i32, i32
  }
  func.func @transform_10(%arg0: i32) -> (i32, i32) {
    %c0_i32 = arith.constant 0 : i32
    %c0_i32_0 = arith.constant 0 : i32
    %c0_i32_1 = arith.constant 0 : i32
    return %c0_i32, %c0_i32_0 : i32, i32
  }
  func.func @transform_11(%arg0: i32) -> (i32, i32) {
    %c0_i32 = arith.constant 0 : i32
    %c0_i32_0 = arith.constant 0 : i32
    %c0_i32_1 = arith.constant 0 : i32
    return %c0_i32, %c0_i32_0 : i32, i32
  }
  func.func @transform_12(%arg0: i32) -> (i32, i32) {
    %c0_i32 = arith.constant 0 : i32
    %c0_i32_0 = arith.constant 0 : i32
    %c0_i32_1 = arith.constant 0 : i32
    return %c0_i32, %c0_i32_0 : i32, i32
  }
  func.func @transform_13(%arg0: i32) -> (i32, i32, i32) {
    %c0_i32 = arith.constant 0 : i32
    %c0_i32_0 = arith.constant 0 : i32
    %c0_i32_1 = arith.constant 0 : i32
    return %arg0, %c0_i32, %c0_i32_0 : i32, i32, i32
  }
}

</mosaic_0001>

<bundles_post_ra>
// kernel: tpu_custom_call.1
= control target key start
LH: loop header
LB: loop body
LE: loop exit
PB: predicated region body
PF: predicated region fallthrough
CT: control target
= control target key end

     0   :  { %6 = vsyncpa [#allocation3], 0  ;;  %s127_s0 = inlined_call_operand.hbm [shape: f32[8,128], index: 0, kind: input, shape index: {}]   ;;  %s128_s1 = inlined_call_operand.hbm [shape: f32[8,128], index: 1, kind: output, shape index: {}]  }
   0x1   :  { %7 = vsyncpa [#allocation4], 0  ;;  %s91_s6 = smov [#allocation2]   ;;  %s43_s10 = scalar_lea.hbm %s127_s0, 128 }
   0x2   :  { %s14_s7 = sshll.u32 %s91_s6, 4  ;;  %p44_p0 = scmp.ne.s32.totalorder %s127_s0, %s43_s10  ;;  %s15_s7 = int_to_ptr.vmem [resolvable:$true] %s14_s7 }
   0x3   :  { %p47_p1 = scmp.lt.u32.totalorder %s43_s10, %s127_s0 }
   0x5   :  { %p49_p2 = pnand %p47_p1, %p44_p0 }
   0x7   :  { %52 = shalt.err (!%p49_p2)
}
   0x8   :  { %s53_s15 = scalar_lea.vmem %s15_s7, 128  ;;  %p58_p4 = scmp.lt.s32.totalorder %s15_s7, %s15_s7 }
   0x9   :  { %p54_p3 = scmp.ne.s32.totalorder %s15_s7, %s53_s15  ;;  %p59_p5 = scmp.lt.s32.totalorder %s53_s15, %s53_s15 }
   0xb   :  { %p60_p6 = por %p59_p5, %p58_p4 }
   0xd   :  { %p61_p7 = pnand %p60_p6, %p54_p3 }
   0xf   :  { %64 = shalt.err (!%p61_p7)
}
  0x10   :  { %17 = dma.hbm_to_vmem [thread:$0]  %s127_s0, 128, %s15_s7, [#allocation3]  }
  0x11   :  { %87 = dma.done.wait [#allocation3], 128  }
  0x12   :  { %88 = vsyncadd [#allocation3], 4294967168  ;;  %v21_v0 = vld [vmem:[#allocation2] sm:$0xff]  ;;  %s92_s18 = smov [#allocation5]  }
  0x13   :  { %41 = verf.f32 %v21_v0  ;;  %s30_s19 = sshll.u32 %s92_s18, 4  ;;  %s31_s19 = int_to_ptr.vmem [resolvable:$true] %s30_s19 }
  0x14   :  { %s65_s20 = scalar_lea.vmem %s31_s19, 128  ;;  %p70_p9 = scmp.lt.s32.totalorder %s31_s19, %s31_s19 }
  0x15   :  { %p66_p8 = scmp.ne.s32.totalorder %s31_s19, %s65_s20  ;;  %p71_p10 = scmp.lt.s32.totalorder %s65_s20, %s65_s20 }
  0x17   :  { %p72_p11 = por %p71_p10, %p70_p9 }
  0x19   :  { %p73_p12 = pnand %p72_p11, %p66_p8 }
  0x1d   :  { %v42_v1 = vpop.eup %41 }
  0x1e   :  { %23 = vst [vmem:[#allocation5] sm:$0xff] %v42_v1 }
  0x1f   :  { %76 = shalt.err (!%p73_p12)
}
  0x20   :  { %s77_s0 = scalar_lea.hbm %s128_s1, 128 }
  0x21   :  { %p78_p13 = scmp.ne.s32.totalorder %s128_s1, %s77_s0  ;;  %p81_p0 = scmp.lt.u32.totalorder %s77_s0, %s128_s1 }
  0x23   :  { %p83_p1 = pnand %p81_p0, %p78_p13 }
  0x25   :  { %86 = shalt.err (!%p83_p1)
}
  0x26   :  { %33 = dma.vmem_to_hbm [thread:$0]  %s31_s19, 128, %s128_s1, [#allocation4]  }
  0x27   :  { %89 = dma.done.wait [#allocation4], 128  }
  0x28   :  { %90 = vsyncadd [#allocation4], 4294967168 }
  0x29   :  { %37 = vsyncpa [#allocation3], 1 }
  0x2a   :  { %38 = vsyncpa [#allocation4], 1 }

// kernel: tpu_custom_call.1
= control target key start
LH: loop header
LB: loop body
LE: loop exit
PB: predicated region body
PF: predicated region fallthrough
CT: control target
= control target key end

     0   :  { %7 = vsyncpa [#allocation3], 0  ;;  %s690_s0 = inlined_call_operand.hbm [shape: f32[2,8,128], index: 0, kind: input, shape index: {}]   ;;  %s691_s1 = inlined_call_operand.hbm [shape: f32[8,128], index: 1, kind: input, shape index: {}]   ;;  %s692_s2 = inlined_call_operand.hbm [shape: f32[2,8,128], index: 2, kind: output, shape index: {}]  }
   0x1   :  { %9 = vsyncpa [#allocation3 + $0x1], 0 }
   0x2   :  { %10 = vsyncpa [#allocation6], 0 }
   0x3   :  { %11 = vsyncpa [#allocation4], 0 }
   0x4   :  { %13 = vsyncpa [#allocation4 + $0x1], 0  ;;  %s489_s9 = smov 0   ;;  %s491_s10 = smov 0  }
   0x5   :  { %s493_s11 = smov 0   ;;  %s495_s12 = smov 0  }
   0x6 LB: > { %s510_s13 = sadd.s32 4294967295, %s469_s12   ;;  %s270_s14 = sadd.s32 4294967294, %s469_s12   ;;  %s469_s12 = sphi %s495_s12, %s716_s12   ;;  %s465_s11 = sphi %s493_s11, %s715_s11   ;;  %s461_s10 = sphi %s491_s10, %s714_s10   ;;  %s457_s9 = sphi %s489_s9, %s713_s9  }
   0x7   : > { %p39_p0 = scmp.ne.s32.totalorder %s461_s10, %s457_s9  ;;  %p693_p1 = scmp.eq.s32.totalorder %s510_s13, 0 }
   0x8   : > { %p90_p3 = scmp.eq.s32.totalorder %s270_s14, 1  ;;  %p271_p5 = scmp.ge.s32.totalorder %s469_s12, 1 }
   0x9   : > { %p519_p4 = por %p693_p1, %p39_p0  ;;  %p97_p7 = scmp.lt.s32.totalorder %s469_s12, 3 }
   0xa   : > { %p524_p6 = por %p90_p3, %p39_p0  ;;  %s471_s18 = smov [#allocation5]  }
   0xb   : > { %s696_s15 = scalar_select %p519_p4, 1, 0 }
   0xc   : > { %s697_s16 = scalar_select %p524_p6, 1, 0 }
   0xd   : > { %p529_p8 = pnand %p271_p5, %p97_p7  ;;  %s110_s19 = sshll.u32 %s471_s18, 4  ;;  %s111_s19 = int_to_ptr.vmem [resolvable:$true] %s110_s19 }
   0xe   : > { %s537_s20 = sadd.s32 1, %s469_s12   ;;  %s26_s24 = sadd.s32 1, %s465_s11 }
   0xf   : > { %s698_s17 = scalar_select %p529_p8, 1, 0 }
  0x10   : > { %p292_p10 = pneg %p529_p8  ;;  %s23_s22 = ssub.s32 %s469_s12, %s537_s20 }
  0x11   : > { %p547_p12 = scmp.eq.s32.totalorder %s23_s22, 0  ;;  %s341_s27 = scalar_lea.hbm %s691_s1, 128 }
  0x12   : > { %p541_p11 = pnand %p292_p10, %p693_p1  ;;  %p342_p0 = scmp.ne.s32.totalorder %s691_s1, %s341_s27 }
  0x13   : > { %s700_s23 = scalar_select %p547_p12, 1, 0 }
  0x14   : > { %p343_p3 = pneg %p541_p11  ;;  %p348_p10 = scmp.lt.u32.totalorder %s341_s27, %s691_s1 }
  0x16   : > { %p344_p5 = pnand %p343_p3, %p342_p0 }
  0x18   : > { %p345_p7 = pneg %p344_p5 }
  0x1a   : > { %p350_p9 = pnand %p348_p10, %p345_p7 }
  0x1c   : > { %353 = shalt.err (!%p350_p9)
}
  0x1d   : > { %s354_s4 = scalar_lea.vmem %s111_s19, 128  ;;  %p362_p6 = scmp.lt.s32.totalorder %s111_s19, %s111_s19 }
  0x1e   : > { %p355_p1 = scmp.ne.s32.totalorder %s111_s19, %s354_s4  ;;  %p363_p4 = scmp.lt.s32.totalorder %s354_s4, %s354_s4 }
  0x20   : > { %p357_p2 = pnand %p355_p1, %p343_p3  ;;  %p364_p8 = por %p363_p4, %p362_p6 }
  0x22   : > { %p358_p13 = pneg %p357_p2 }
  0x24   : > { %p365_p12 = pnand %p364_p8, %p358_p13 }
  0x26   : > { %368 = shalt.err (!%p365_p12)
}
  0x27   : > { %295 = dma.hbm_to_vmem [thread:$0]  (!%p541_p11), %s691_s1, 128, %s111_s19, [#allocation6]  }
  0x28   : > { %p701_p1 = scmp.ne.s32.totalorder %s700_s23, 0  ;;  %p34_p2 = scmp.eq.s32.totalorder %s469_s12, 0 }
  0x29   : > { %p702_p4 = scmp.ne.s32.totalorder %s465_s11, %s461_s10  ;;  %p703_p6 = scmp.eq.s32.totalorder %s510_s13, 1 }
  0x2a   : > { %s573_s7 = scalar_select %p701_p1, %s465_s11, %s26_s24  }
  0x2b   : > { %p581_p8 = por %p703_p6, %p702_p4  ;;  %p305_p9 = scmp.lt.s32.totalorder %s469_s12, 2 }
  0x2c   : > { %s121_s14 = sand.u32 1, %s465_s11   ;;  %p705_p12 = pmov %p702_p4 }
  0x2d   : > { %s274_s18 = sshll.u32 %s121_s14, 3  ;;  %s275_s21 = sshll.u32 %s469_s12, 7 }
  0x2e   : > { %p35_p13 = por %p34_p2, %p705_p12  ;;  %s594_s19 = scalar_lea.hbm %s690_s0, %s275_s21 }
  0x2f   : > { %s125_s23 = scalar_lea.vmem [#allocation2], %s274_s18  ;;  %s122_s27 = scalar_lea.sflag [#allocation3], %s121_s14 }
  0x30   : > { %s132_s24 = sshll.u32 %s125_s23, 4  ;;  %p596_p11 = pnand %p305_p9, %p35_p13  ;;  %s600_s24 = int_to_ptr.vmem [resolvable:$true] %s132_s24 }
  0x31   : > { %s369_s28 = scalar_lea.hbm %s594_s19, 128  ;;  %s374_s3 = scalar_lea.hbm %s690_s0, 256 }
  0x32   : > { %p370_p0 = scmp.ne.s32.totalorder %s594_s19, %s369_s28  ;;  %p371_p3 = pneg %p596_p11 }
  0x33   : > { %p375_p10 = scmp.lt.u32.totalorder %s594_s19, %s690_s0  ;;  %p376_p1 = scmp.lt.u32.totalorder %s374_s3, %s369_s28 }
  0x34   : > { %p372_p5 = pnand %p371_p3, %p370_p0  ;;  %p378_p4 = scmp.lt.u32.totalorder %s369_s28, %s594_s19 }
  0x35   : > { %p377_p2 = por %p376_p1, %p375_p10 }
  0x36   : > { %p373_p7 = pneg %p372_p5 }
  0x37   : > { %p379_p6 = por %p378_p4, %p377_p2 }
  0x39   : > { %p380_p9 = pnand %p379_p6, %p373_p7 }
  0x3b   : > { %383 = shalt.err (!%p380_p9)
}
  0x3c   : > { %s384_s6 = scalar_lea.vmem %s600_s24, 128  ;;  %s472_s14 = smov [#allocation2]  }
  0x3d   : > { %p385_p12 = scmp.ne.s32.totalorder %s600_s24, %s384_s6  ;;  %s389_s18 = sshll.u32 %s472_s14, 4  ;;  %s390_s18 = int_to_ptr.vmem [resolvable:$false] %s389_s18 }
  0x3e   : > { %s391_s21 = scalar_lea.vmem %s390_s18, 256  ;;  %p392_p5 = scmp.lt.s32.totalorder %s600_s24, %s390_s18 }
  0x3f   : > { %p387_p13 = pnand %p385_p12, %p371_p3  ;;  %p393_p10 = scmp.lt.s32.totalorder %s391_s21, %s384_s6 }
  0x41   : > { %p388_p0 = pneg %p387_p13  ;;  %p394_p1 = por %p393_p10, %p392_p5 }
  0x43   : > { %p395_p2 = pnand %p394_p1, %p388_p0 }
  0x45   : > { %398 = shalt.err (!%p395_p2)
}
  0x46   : > { %299 = dma.hbm_to_vmem [thread:$0]  (!%p596_p11), %s594_s19, 128, %s600_s24, %s122_s27  }
  0x47   : > { %p707_p7 = scmp.ne.s32.totalorder %s698_s17, 0 }
  0x48   : > { %s630_s22 = sand.u32 (!%p707_p7), 1, %s461_s10   ;;  %p708_p3 = scmp.ne.s32.totalorder (!%p707_p7), %s696_s15, 0 }
  0x49   : > { %141 = sbr.rel (%p707_p7) target bundleno = 109 (0x6d), region = 28  ;;  %s277_s25 = sshll.u32 (!%p707_p7), %s630_s22, 3 }
  0x4a   : > { %s144_s23 = scalar_lea.sflag (!%p707_p7), [#allocation3], %s630_s22  ;;  %s147_s28 = scalar_lea.vmem (!%p707_p7), [#allocation2], %s277_s25 }
  0x50   : > { %444 = dma.done.wait (%p708_p3), %s144_s23, 128  }
  0x51   : > { %446 = vsyncadd (%p708_p3), %s144_s23, 4294967168  ;;  %p709_p4 = scmp.eq.s32.totalorder %s510_s13, 0 }
  0x53   : > { %448 = dma.done.wait (%p709_p4), [#allocation6], 128   ;;  %p710_p11 = pmov %p709_p4 }
  0x54   : > { %s171_s17 = scalar_lea.vmem [#allocation7], %s277_s25  ;;  %s281_s24 = sshll.u32 %s510_s13, 7  ;;  %v172_v0 = vld [vmem:[%s147_s28] sm:$0xff]  ;;  %v173_v1 = vld [vmem:[#allocation5] sm:$0xff] }
  0x55   : > { %450 = vsyncadd (%p710_p11), [#allocation6], 4294967168  ;;  %s190_s19 = sshll.u32 %s171_s17, 4  ;;  %v174_v2 = vadd.f32 %v173_v1, %v172_v0  ;;  %s648_s27 = scalar_lea.hbm %s692_s2, %s281_s24  ;;  %s643_s19 = int_to_ptr.vmem [resolvable:$true] %s190_s19 }
  0x56   : > { %s177_s29 = scalar_lea.sflag [#allocation4], %s630_s22  ;;  %s399_s30 = scalar_lea.vmem %s643_s19, 128 }
  0x57   : > { %175 = vst [vmem:[%s171_s17] sm:$0xff] %v174_v2  ;;  %p400_p6 = scmp.ne.s32.totalorder %s643_s19, %s399_s30  ;;  %s473_s13 = smov [#allocation7]  }
  0x58   : > { %s403_s3 = sshll.u32 %s473_s13, 4  ;;  %s404_s3 = int_to_ptr.vmem [resolvable:$false] %s403_s3 }
  0x59   : > { %p401_p9 = pnand %p400_p6, %p581_p8  ;;  %s405_s4 = scalar_lea.vmem %s404_s3, 256 }
  0x5a   : > { %p406_p13 = scmp.lt.s32.totalorder %s643_s19, %s404_s3  ;;  %p407_p0 = scmp.lt.s32.totalorder %s405_s4, %s399_s30 }
  0x5b   : > { %p402_p12 = pneg %p401_p9 }
  0x5c   : > { %p408_p5 = por %p407_p0, %p406_p13 }
  0x5e   : > { %p409_p10 = pnand %p408_p5, %p402_p12 }
  0x60   : > { %412 = shalt.err (!%p409_p10)
}
  0x61   : > { %s413_s5 = scalar_lea.hbm %s648_s27, 128  ;;  %s417_s18 = scalar_lea.hbm %s692_s2, 256 }
  0x62   : > { %p414_p1 = scmp.ne.s32.totalorder %s648_s27, %s413_s5  ;;  %p418_p3 = scmp.lt.u32.totalorder %s648_s27, %s692_s2 }
  0x63   : > { %p419_p4 = scmp.lt.u32.totalorder %s417_s18, %s413_s5  ;;  %p421_p6 = scmp.lt.u32.totalorder %s413_s5, %s648_s27 }
  0x64   : > { %p415_p2 = pnand %p414_p1, %p581_p8 }
  0x65   : > { %p420_p11 = por %p419_p4, %p418_p3 }
  0x66   : > { %p416_p7 = pneg %p415_p2 }
  0x67   : > { %p422_p9 = por %p421_p6, %p420_p11 }
  0x69   : > { %p423_p12 = pnand %p422_p9, %p416_p7 }
  0x6b   : > { %426 = shalt.err (!%p423_p12)
}
  0x6c   : > { %290 = dma.vmem_to_hbm [thread:$0]  (%p581_p8), %s643_s19, 128, %s648_s27, %s177_s29  }
  0x6d PF: > { %s202_s25 = sand.u32 1, %s457_s9   ;;  %p711_p13 = scmp.ne.s32.totalorder %s697_s16, 0 }
  0x6e   : > { %p712_p0 = scmp.ge.s32.totalorder %s469_s12, 2  ;;  %s203_s23 = scalar_lea.sflag [#allocation4], %s202_s25 }
  0x70   : > { %p301_p5 = pnand %p712_p0, %p711_p13 }
  0x72   : > { %452 = dma.done.wait (!%p301_p5), %s203_s23, 128  }
  0x73   : > { %454 = vsyncadd (!%p301_p5), %s203_s23, 4294967168  ;;  %p16_p10 = scmp.ge.s32.totalorder %s537_s20, 4   ;;  %s713_s9 = smov %s461_s10 }
  0x74   : > { %s714_s10 = smov %s465_s11  ;;  %s715_s11 = smov %s573_s7 }
  0x75   : > { %s716_s12 = smov %s537_s20  ;;  %18 = sbr.rel (!%p16_p10) target bundleno = 6 (0x6), region = 77 }
  0x7c   :  { %208 = vsyncpa [#allocation3], 1 }
  0x7d   :  { %210 = vsyncpa [#allocation3 + $0x1], 1 }
  0x7e   :  { %211 = vsyncpa [#allocation6], 1 }
  0x7f   :  { %212 = vsyncpa [#allocation4], 1 }
  0x80   :  { %214 = vsyncpa [#allocation4 + $0x1], 1 }

// kernel: tpu_custom_call.1
= control target key start
LH: loop header
LB: loop body
LE: loop exit
PB: predicated region body
PF: predicated region fallthrough
CT: control target
= control target key end

     0   :  { %vm54_vm0 = vcmask 261120   ;;  %s3531_s0 = inlined_call_operand.vmem [shape: f32[2,8,32], index: 0, kind: input, shape index: {}]   ;;  %s3532_s1 = inlined_call_operand.vmem [shape: f32[1,32], index: 1, kind: input, shape index: {}]   ;;  %s3533_s2 = inlined_call_operand.vmem [shape: f32[1,32], index: 2, kind: input, shape index: {}]   ;;  %s3534_s3 = inlined_call_operand.vmem [shape: bf16[32,96], index: 3, kind: input, shape index: {}]   ;;  %s3535_s4 = inlined_call_operand.vmem [shape: f32[1,96], index: 4, kind: input, shape index: {}]   ;;  %s3536_s5 = inlined_call_operand.vmem [shape: bf16[32,32], index: 5, kind: input, shape index: {}]   ;;  %s3537_s6 = inlined_call_operand.vmem [shape: f32[1,32], index: 6, kind: input, shape index: {}]   ;;  %s3538_s7 = inlined_call_operand.vmem [shape: f32[1,32], index: 7, kind: input, shape index: {}]   ;;  %s3539_s8 = inlined_call_operand.vmem [shape: f32[1,32], index: 8, kind: input, shape index: {}]   ;;  %s3540_s9 = inlined_call_operand.vmem [shape: bf16[32,128], index: 9, kind: input, shape index: {}]   ;;  %s3541_s10 = inlined_call_operand.vmem [shape: f32[1,128], index: 10, kind: input, shape index: {}]   ;;  %s3542_s11 = inlined_call_operand.vmem [shape: bf16[128,32], index: 11, kind: input, shape index: {}]   ;;  %s3543_s12 = inlined_call_operand.vmem [shape: f32[1,32], index: 12, kind: input, shape index: {}]   ;;  %s3544_s13 = inlined_call_operand.hbm [shape: f32[2,8,32], index: 13, kind: output, shape index: {}]  }
   0x1   :  { %v50_v0 = vld [vmem:[%s3531_s0] sm:$0xff]  ;;  %v51_v1 = vld [vmem:[%s3531_s0 + $0x8] sm:$0xff] }
   0x2   :  { %v55_v2 = vsel %vm54_vm0, %v50_v0, 0.0  ;;  %v58_v3 = vsel %vm54_vm0, %v51_v1, 0.0 }
   0x3   :  { %56 = vadd.xlane.f32.xlu0 %v55_v2 }
   0x7   :  { %59 = vadd.xlane.f32.xlu0 %v58_v3 }
   0x8   :  { %18 = vsyncpa [#allocation3], 0  ;;  %v2828_v14 = vld [vmem:[%s3534_s3] sm:$0xff]   ;;  %v2910_v15 = vmov 0.0   ;;  %v2829_v16 = vld [vmem:[%s3534_s3 + $0x8] sm:$0xff]   ;;  %vm2911_vm1 = vmmov 0   ;;  %v193_v51 = vlaneseq }
   0x9   :  { %2659 = vmatprep.subr.bf16.mxu0 %v2910_v15  ;;  %2679 = vmatprep.subr.bf16.mxu1 %v2910_v15  ;;  %v2552_v25 = vld [vmem:[%s3532_s1] ss:$0 sm:$0xff]  ;;  %s2912_s1 = smov 112   ;;  %s2914_s21 = smov 104   ;;  %v2917_v49 = vmov 1983009808  }
   0xa   :  { %2660 = vmatpush3.bf16.msra.mxu0 %v2828_v14  ;;  %2663 = vmatprep.mubr.msk.bf16.mxu0 %vm2911_vm1, %v2910_v15  ;;  %v2553_v29 = vld [vmem:[%s3533_s2] ss:$0 sm:$0xff]  ;;  %s2913_s2 = smov 120   ;;  %s2915_s22 = smov 96   ;;  %v191_v50 = vunpack.c.l.s4 %v2917_v49  ;;  %v2918_v53 = vmov 1934713408  }
   0xb   :  { %2661 = vmatprep.subr.bf16.mxu0 %v2910_v15  ;;  %2681 = vmatprep.mubr.msk.bf16.mxu1 %vm2911_vm1, %v2910_v15  ;;  %v2554_v34 = vld [vmem:[%s3535_s4] ss:$0 sm:$0xff]  ;;  %s2916_s4 = smov 64   ;;  %v223_v54 = vunpack.c.l.s4 %v2918_v53  ;;  %v194_v56 = vshrl.u32 %v193_v51, 7  ;;  %vm1090_vm2 = vcmask 64512   ;;  %vm1542_vm3 = vcmask 1043456  }
   0xc   :  { %v192_v55 = vunpack.c.0.s8 %v191_v50  ;;  %s2920_s27 = smov 8   ;;  %s2921_s28 = smov 24   ;;  %vm2222_vm4 = vcmask 130048   ;;  %vm2225_vm5 = vcmask 195584  }
   0xd   :  { %v224_v59 = vunpack.c.0.s8 %v223_v54 }
   0xe   :  { %2662 = vmatpush3.bf16.msra.mxu0 %v2829_v16  ;;  %v3068_v60 = vsub.s32 %v192_v55, %v194_v56 }
   0xf   :  { %2667 = vmatprep.subr.bf16.mxu0 %v2910_v15  ;;  %v3070_v3 = vsub.s32 %v224_v59, %v194_v56 }
  0x90   :  { %v57_v4 = vpop.xlane.xlu0 %56 }
  0x91   :  { %v62_v5 = vmul.f32 0.03125, %v57_v4 }
  0x93   :  { %v64_v6 = vsub.f32 %v50_v0, %v62_v5 }
  0x94   :  { %v60_v7 = vpop.xlane.xlu0 %59 }
  0x95   :  { %v63_v8 = vmul.f32 0.03125, %v60_v7  ;;  %v66_v9 = vmul.f32 %v64_v6, %v64_v6 }
  0x97   :  { %v65_v10 = vsub.f32 %v51_v1, %v63_v8  ;;  %v68_v11 = vsel %vm54_vm0, %v66_v9, 0.0 }
  0x98   :  { %69 = vadd.xlane.f32.xlu1 %v68_v11 }
  0x99   :  { %v67_v12 = vmul.f32 %v65_v10, %v65_v10 }
  0x9b   :  { %v71_v13 = vsel %vm54_vm0, %v67_v12, 0.0 }
  0x9c   :  { %72 = vadd.xlane.f32.xlu1 %v71_v13 }
 0x125   :  { %v70_v17 = vpop.xlane.xlu1 %69 }
 0x126   :  { %v74_v18 = vmul.f32 0.03125, %v70_v17 }
 0x128   :  { %v76_v19 = vadd.f32 1e-05, %v74_v18 }
 0x129   :  { %v73_v20 = vpop.xlane.xlu1 %72 }
 0x12a   :  { %2842 = vrsqrt.f32 %v76_v19  ;;  %v75_v21 = vmul.f32 0.03125, %v73_v20 }
 0x12c   :  { %v77_v22 = vadd.f32 1e-05, %v75_v21 }
 0x12e   :  { %2844 = vrsqrt.f32 %v77_v22 }
 0x134   :  { %v2843_v23 = vpop.eup %2842 }
 0x135   :  { %v80_v24 = vmul.f32 %v2843_v23, %v64_v6 }
 0x137   :  { %v88_v28 = vmul.f32 %v2552_v25, %v80_v24 }
 0x138   :  { %v2845_v26 = vpop.eup %2844 }
 0x139   :  { %v81_v27 = vmul.f32 %v2845_v26, %v65_v10  ;;  %v96_v31 = vadd.f32 %v2553_v29, %v88_v28 }
 0x13b   :  { %v89_v30 = vmul.f32 %v2552_v25, %v81_v27 }
 0x13d   :  { %v97_v32 = vadd.f32 %v2553_v29, %v89_v30 }
 0x13f   :  { %v98_v33 = vpack.c.bf16 %v97_v32, %v96_v31 }
 0x141   :  { %2664 = vmatmul.mubr.msk.bf16.vlgmr.msra.gmra.mrb[0].mxu0 %vm54_vm0, %v98_v33 }
 0x142   :  { %2669 = vmatprep.mubr.msk.bf16.mxu0 %vm2911_vm1, %v2910_v15 }
 0x214   :  { %v159_v35 = vpop.f32.mrb[0].mxu0 }
 0x215   :  { %v160_v36 = vadd.f32 %v2554_v34, %v159_v35  ;;  %v2665_v37 = vpop.f32.mrb[1].mxu0 }
 0x216   :  { %v162_v38 = vpop.f32.mrb[2].mxu0 }
 0x217   :  { %474 = vrot.lane.b32.xlu1 %v160_v36, %s2912_s1  ;;  %470 = vrot.lane.b32.xlu0 %v160_v36, %s2913_s2  ;;  %v2666_v39 = vpop.f32.mrb[3].mxu0  ;;  %v3032_v40 = vadd.f32 %v2554_v34, %v162_v38  ;;  %v3039_v43 = vmul.f32 0.35355338, %v160_v36 }
 0x219   :  { %v3057_v48 = vmul.f32 0.35355338, %v3032_v40 }
 0x21b   :  { %478 = vrot.lane.b32.xlu1 %v160_v36, %s2914_s21  ;;  %476 = vrot.lane.b32.xlu0 %v3032_v40, %s2912_s1 }
 0x21f   :  { %482 = vrot.lane.b32.xlu0 %v160_v36, %s2915_s22  ;;  %472 = vrot.lane.b32.xlu1 %v3032_v40, %s2913_s2 }
 0x223   :  { %480 = vrot.lane.b32.xlu1 %v3032_v40, %s2914_s21 }
 0x289   :  { %v475_v41 = vpop.permute.xlu1 %474  ;;  %v471_v42 = vpop.permute.xlu0 %470 }
 0x28a   :  { %490 = vrot.lane.b32.xlu0 %v475_v41, %s2915_s22  ;;  %486 = vrot.lane.b32.xlu1 %v471_v42, %s2915_s22 }
 0x28d   :  { %v479_v44 = vpop.permute.xlu1 %478  ;;  %v3050_v46 = vpop.permute.xlu0 %476 }
 0x28e   :  { %170 = vrot.lane.b32.xlu0 %v3039_v43, %s2913_s2  ;;  %494 = vrot.lane.b32.xlu1 %v479_v44, %s2915_s22 }
 0x291   :  { %v3046_v45 = vpop.permute.xlu1 %472  ;;  %v483_v52 = vpop.permute.xlu0 %482 }
 0x292   :  { %182 = vrot.lane.b32.xlu0 %v3039_v43, %s2914_s21  ;;  %176 = vrot.lane.b32.xlu1 %v3039_v43, %s2912_s1 }
 0x295   :  { %v3052_v47 = vpop.permute.xlu1 %480 }
 0x296   :  { %484 = vrot.lane.b32.xlu1 %v3032_v40, %s2915_s22  ;;  %488 = vrot.lane.b32.xlu0 %v3046_v45, %s2915_s22 }
 0x29a   :  { %492 = vrot.lane.b32.xlu1 %v3050_v46, %s2915_s22  ;;  %496 = vrot.lane.b32.xlu0 %v3052_v47, %s2915_s22 }
 0x29e   :  { %178 = vrot.lane.b32.xlu0 %v3057_v48, %s2912_s1  ;;  %172 = vrot.lane.b32.xlu1 %v3057_v48, %s2913_s2 }
 0x2a2   :  { %786 = vrot.lane.b32.xlu0 %v160_v36, %s2916_s4  ;;  %184 = vrot.lane.b32.xlu1 %v3057_v48, %s2914_s21 }
 0x2a6   :  { %794 = vrot.lane.b32.xlu0 %v475_v41, %s2916_s4  ;;  %790 = vrot.lane.b32.xlu1 %v471_v42, %s2916_s4 }
 0x2aa   :  { %798 = vrot.lane.b32.xlu1 %v479_v44, %s2916_s4 }
 0x2fc   :  { %v491_v57 = vpop.permute.xlu0 %490  ;;  %v487_v58 = vpop.permute.xlu1 %486 }
 0x2fd   :  { %v506_v61 = vcombine.low %v483_v52, %v491_v57  ;;  %v507_v62 = vcombine.high %v483_v52, %v491_v57 }
 0x2ff   :  { %v514_v4 = vrot.slane %v506_v61, %v3068_v60  ;;  %v521_v5 = vrot.slane %v507_v62, %v3068_v60 }
 0x300   :  { %v171_v63 = vpop.permute.xlu0 %170  ;;  %v495_v0 = vpop.permute.xlu1 %494 }
 0x301   :  { %v522_v1 = vcombine.low %v487_v58, %v495_v0  ;;  %v523_v2 = vcombine.high %v487_v58, %v495_v0 }
 0x303   :  { %v530_v6 = vrot.slane %v522_v1, %v3068_v60  ;;  %v537_v7 = vrot.slane %v523_v2, %v3068_v60 }
 0x304   :  { %v183_v8 = vpop.permute.xlu0 %182  ;;  %v177_v9 = vpop.permute.xlu1 %176 }
 0x305   :  { %v538_v10 = vcombine.low %v514_v4, %v530_v6  ;;  %v539_v11 = vcombine.high %v514_v4, %v530_v6  ;;  %v554_v12 = vcombine.low %v521_v5, %v537_v7  ;;  %v555_v13 = vcombine.high %v521_v5, %v537_v7 }
 0x306   :  { %v204_v14 = vcombine.low %v171_v63, %v183_v8  ;;  %v205_v16 = vcombine.high %v171_v63, %v183_v8  ;;  %v188_v17 = vcombine.low %v3039_v43, %v177_v9  ;;  %v189_v18 = vcombine.high %v3039_v43, %v177_v9 }
 0x307   :  { %v546_v19 = vrot.slane %v538_v10, %v3070_v3  ;;  %v553_v20 = vrot.slane %v539_v11, %v3070_v3  ;;  %v562_v21 = vrot.slane %v554_v12, %v3070_v3  ;;  %v569_v22 = vrot.slane %v555_v13, %v3070_v3 }
 0x308   :  { %v212_v23 = vrot.slane %v204_v14, %v3068_v60  ;;  %v219_v24 = vrot.slane %v205_v16, %v3068_v60  ;;  %v196_v25 = vrot.slane %v188_v17, %v3068_v60  ;;  %v203_v26 = vrot.slane %v189_v18, %v3068_v60  ;;  %v489_v27 = vpop.permute.xlu0 %488  ;;  %v485_v28 = vpop.permute.xlu1 %484 }
 0x309   :  { %v642_v29 = vcombine.low %v546_v19, %v553_v20  ;;  %v2562_v30 = vcombine.high %v546_v19, %v553_v20  ;;  %v658_v31 = vcombine.low %v562_v21, %v569_v22  ;;  %v2563_v32 = vcombine.high %v562_v21, %v569_v22 }
 0x30a   :  { %v220_v33 = vcombine.low %v196_v25, %v212_v23  ;;  %v221_v34 = vcombine.high %v196_v25, %v212_v23  ;;  %v236_v35 = vcombine.low %v203_v26, %v219_v24  ;;  %v237_v36 = vcombine.high %v203_v26, %v219_v24 }
 0x30b   :  { %v3087_v37 = vrot.slane %v642_v29, %v3068_v60  ;;  %v3090_v38 = vrot.slane %v2562_v30, %v3068_v60  ;;  %v3093_v39 = vrot.slane %v658_v31, %v3068_v60  ;;  %v3096_v41 = vrot.slane %v2563_v32, %v3068_v60 }
 0x30c   :  { %v228_v42 = vrot.slane %v220_v33, %v3070_v3  ;;  %v235_v43 = vrot.slane %v221_v34, %v3070_v3  ;;  %v244_v44 = vrot.slane %v236_v35, %v3070_v3  ;;  %v251_v49 = vrot.slane %v237_v36, %v3070_v3  ;;  %v497_v50 = vpop.permute.xlu0 %496  ;;  %v493_v51 = vpop.permute.xlu1 %492 }
 0x30d   :  { %v590_v52 = vcombine.low %v489_v27, %v497_v50  ;;  %v591_v53 = vcombine.high %v489_v27, %v497_v50  ;;  %v574_v54 = vcombine.low %v485_v28, %v493_v51  ;;  %v575_v55 = vcombine.high %v485_v28, %v493_v51 }
 0x30e   :  { %v324_v56 = vcombine.low %v228_v42, %v235_v43  ;;  %v2558_v57 = vcombine.high %v228_v42, %v235_v43  ;;  %v340_v58 = vcombine.low %v244_v44, %v251_v49  ;;  %v2559_v59 = vcombine.high %v244_v44, %v251_v49 }
 0x30f   :  { %v598_v61 = vrot.slane %v590_v52, %v3068_v60  ;;  %v605_v62 = vrot.slane %v591_v53, %v3068_v60  ;;  %v582_v63 = vrot.slane %v574_v54, %v3068_v60  ;;  %v589_v0 = vrot.slane %v575_v55, %v3068_v60 }
 0x310   :  { %v3107_v1 = vrot.slane %v324_v56, %v3068_v60  ;;  %v3110_v2 = vrot.slane %v2558_v57, %v3068_v60  ;;  %v3113_v4 = vrot.slane %v340_v58, %v3068_v60  ;;  %v3116_v5 = vrot.slane %v2559_v59, %v3068_v60  ;;  %v179_v6 = vpop.permute.xlu0 %178  ;;  %v173_v7 = vpop.permute.xlu1 %172 }
 0x311   :  { %v606_v8 = vcombine.low %v582_v63, %v598_v61  ;;  %v607_v9 = vcombine.high %v582_v63, %v598_v61  ;;  %v622_v10 = vcombine.low %v589_v0, %v605_v62  ;;  %v623_v11 = vcombine.high %v589_v0, %v605_v62 }
 0x312   :  { %v256_v14 = vcombine.low %v3057_v48, %v179_v6  ;;  %v257_v16 = vcombine.high %v3057_v48, %v179_v6  ;;  %v674_v19 = vcombine.low %v3087_v37, %v3090_v38  ;;  %v690_v20 = vcombine.low %v3093_v39, %v3096_v41 }
 0x313   :  { %v614_v12 = vrot.slane %v606_v8, %v3070_v3  ;;  %v621_v13 = vrot.slane %v607_v9, %v3070_v3  ;;  %v356_v21 = vcombine.low %v3107_v1, %v3110_v2  ;;  %v372_v22 = vcombine.low %v3113_v4, %v3116_v5 }
 0x314   :  { %v787_v17 = vpop.permute.xlu0 %786  ;;  %v185_v18 = vpop.permute.xlu1 %184  ;;  %v630_v23 = vrot.slane %v622_v10, %v3070_v3  ;;  %v637_v24 = vrot.slane %v623_v11, %v3070_v3  ;;  %v3133_v26 = vrot.slane %v674_v19, %v3070_v3  ;;  %v3136_v27 = vrot.slane %v690_v20, %v3070_v3 }
 0x315   :  { %v272_v48 = vcombine.low %v173_v7, %v185_v18  ;;  %v273_v25 = vcombine.high %v173_v7, %v185_v18  ;;  %v710_v28 = vcombine.low %v614_v12, %v621_v13  ;;  %v2564_v29 = vcombine.high %v614_v12, %v621_v13 }
 0x316   :  { %v264_v30 = vrot.slane %v256_v14, %v3068_v60  ;;  %v271_v31 = vrot.slane %v257_v16, %v3068_v60  ;;  %v706_v34 = vcombine.low %v3133_v26, %v3136_v27  ;;  %v675_v35 = vcombine.high %v3087_v37, %v3090_v38 }
 0x317   :  { %v280_v32 = vrot.slane %v272_v48, %v3068_v60  ;;  %v287_v33 = vrot.slane %v273_v25, %v3068_v60  ;;  %v726_v43 = vcombine.low %v630_v23, %v637_v24  ;;  %v2565_v44 = vcombine.high %v630_v23, %v637_v24 }
 0x318   :  { %v795_v36 = vpop.permute.xlu0 %794  ;;  %v791_v42 = vpop.permute.xlu1 %790  ;;  %v691_v49 = vcombine.high %v3093_v39, %v3096_v41  ;;  %v778_v55 = vpack.c.bf16 %v706_v34, %v706_v34  ;;  %v3149_v56 = vrot.slane %v675_v35, %v3070_v3  ;;  %v3159_v61 = vrot.slane %v710_v28, %v3068_v60 }
 0x319   :  { %v810_v50 = vcombine.low %v787_v17, %v795_v36  ;;  %v288_v51 = vcombine.low %v264_v30, %v280_v32  ;;  %v289_v52 = vcombine.high %v264_v30, %v280_v32  ;;  %v304_v53 = vcombine.low %v271_v31, %v287_v33 }
 0x31a   :  { %v305_v54 = vcombine.high %v271_v31, %v287_v33  ;;  %v3152_v57 = vrot.slane %v691_v49, %v3070_v3  ;;  %v811_v37 = vcombine.high %v787_v17, %v795_v36  ;;  %v1095_v62 = vsel %vm1090_vm2, %v778_v55, 0 }
 0x31b   :  { %v296_v38 = vrot.slane %v288_v51, %v3070_v3  ;;  %v303_v58 = vrot.slane %v289_v52, %v3070_v3  ;;  %v312_v59 = vrot.slane %v304_v53, %v3070_v3  ;;  %v3165_v6 = vrot.slane %v2564_v29, %v3068_v60  ;;  %2668 = vmatpush3.bf16.xpose.msra.mxu0 %v1095_v62 }
 0x31c   :  { %v319_v39 = vrot.slane %v305_v54, %v3070_v3  ;;  %v799_v41 = vpop.permute.xlu1 %798  ;;  %v708_v63 = vcombine.low %v3149_v56, %v3152_v57  ;;  %v364_v9 = vrot.slane %v356_v21, %v3070_v3  ;;  %v818_v11 = vrot.slane %v810_v50, %v3068_v60  ;;  %2673 = vmatprep.subr.bf16.mxu0 %v2910_v15 }
 0x31d   :  { %v826_v0 = vcombine.low %v791_v42, %v799_v41  ;;  %v392_v7 = vcombine.low %v296_v38, %v303_v58  ;;  %v2560_v8 = vcombine.high %v296_v38, %v303_v58  ;;  %v827_v12 = vcombine.high %v791_v42, %v799_v41 }
 0x31e   :  { %v780_v10 = vpack.c.bf16 %v708_v63, %v708_v63  ;;  %v408_v14 = vcombine.low %v312_v59, %v319_v39  ;;  %v2561_v16 = vcombine.high %v312_v59, %v319_v39  ;;  %v825_v17 = vrot.slane %v811_v37, %v3068_v60 }
 0x31f   :  { %v834_v13 = vrot.slane %v826_v0, %v3068_v60  ;;  %v380_v18 = vrot.slane %v372_v22, %v3070_v3  ;;  %v841_v20 = vrot.slane %v827_v12, %v3068_v60  ;;  %v733_v24 = vrot.slane %v726_v43, %v3068_v60 }
 0x320   :  { %v1187_v19 = vsel %vm1090_vm2, %v780_v10, 0  ;;  %v741_v48 = vrot.slane %v2565_v44, %v3068_v60  ;;  %v3178_v25 = vrot.slane %v392_v7, %v3068_v60  ;;  %v3181_v28 = vrot.slane %v2560_v8, %v3068_v60 }
 0x321   :  { %v842_v23 = vcombine.low %v818_v11, %v834_v13  ;;  %v843_v21 = vcombine.high %v818_v11, %v834_v13  ;;  %2680 = vmatpush3.bf16.xpose.msra.mxu1 %v1187_v19  ;;  %v858_v30 = vcombine.low %v825_v17, %v841_v20  ;;  %v859_v31 = vcombine.high %v825_v17, %v841_v20 }
 0x322   :  { %2691 = vmatprep.subr.bf16.mxu1 %v2910_v15  ;;  %v388_v32 = vcombine.low %v364_v9, %v380_v18  ;;  %v357_v33 = vcombine.high %v3107_v1, %v3110_v2  ;;  %v373_v34 = vcombine.high %v3113_v4, %v3116_v5  ;;  %v707_v35 = vcombine.high %v3133_v26, %v3136_v27 }
 0x323   :  { %v850_v29 = vrot.slane %v842_v23, %v3070_v3  ;;  %v857_v22 = vrot.slane %v843_v21, %v3070_v3  ;;  %v3193_v36 = vrot.slane %v408_v14, %v3068_v60  ;;  %v3196_v42 = vrot.slane %v2561_v16, %v3068_v60 }
 0x324   :  { %v866_v43 = vrot.slane %v858_v30, %v3070_v3  ;;  %v873_v44 = vrot.slane %v859_v31, %v3070_v3  ;;  %v460_v49 = vpack.c.bf16 %v388_v32, %v388_v32  ;;  %v371_v50 = vrot.slane %v357_v33, %v3070_v3 }
 0x325   :  { %v387_v1 = vrot.slane %v373_v34, %v3070_v3  ;;  %v779_v2 = vpack.c.bf16 %v707_v35, %v707_v35  ;;  %v946_v4 = vcombine.low %v850_v29, %v857_v22  ;;  %v2566_v5 = vcombine.high %v850_v29, %v857_v22 }
 0x326   :  { %v962_v51 = vcombine.low %v866_v43, %v873_v44  ;;  %v2567_v26 = vcombine.high %v866_v43, %v873_v44  ;;  %2670 = vmatmul.mubr.msk.bf16.vlgmr.msra.gmra.mrb[4].mxu0 %vm1090_vm2, %v460_v49  ;;  %v742_v53 = vcombine.low %v3159_v61, %v3165_v6  ;;  %v424_v54 = vcombine.low %v3178_v25, %v3181_v28 }
 0x327   :  { %v390_v27 = vcombine.low %v371_v50, %v387_v1  ;;  %v1141_v52 = vsel %vm1090_vm2, %v779_v2, 0  ;;  %v440_v55 = vcombine.low %v3193_v36, %v3196_v42  ;;  %v758_v37 = vcombine.low %v733_v24, %v741_v48  ;;  %2675 = vmatprep.mubr.msk.bf16.mxu0 %vm2911_vm1, %v2910_v15 }
 0x328   :  { %2674 = vmatpush3.bf16.xpose.msra.mxu0 %v1141_v52  ;;  %v750_v58 = vrot.slane %v742_v53, %v3070_v3  ;;  %v389_v59 = vcombine.high %v364_v9, %v380_v18  ;;  %v709_v39 = vcombine.high %v3149_v56, %v3152_v57  ;;  %v953_v41 = vrot.slane %v946_v4, %v3068_v60 }
 0x329   :  { %v462_v38 = vpack.c.bf16 %v390_v27, %v390_v27  ;;  %2685 = vmatprep.subr.bf16.mxu0 %v2910_v15  ;;  %v961_v62 = vrot.slane %v2566_v5, %v3068_v60  ;;  %v766_v63 = vrot.slane %v758_v37, %v3070_v3  ;;  %v743_v0 = vcombine.high %v3159_v61, %v3165_v6 }
 0x32a   :  { %v969_v7 = vrot.slane %v962_v51, %v3068_v60  ;;  %v977_v8 = vrot.slane %v2567_v26, %v3068_v60  ;;  %v781_v9 = vpack.c.bf16 %v709_v39, %v709_v39  ;;  %v759_v10 = vcombine.high %v733_v24, %v741_v48 }
 0x32b   :  { %2682 = vmatmul.mubr.msk.bf16.vlgmr.msra.gmra.mrb[0].mxu1 %vm1090_vm2, %v462_v38  ;;  %v774_v11 = vcombine.low %v750_v58, %v766_v63  ;;  %v432_v56 = vrot.slane %v424_v54, %v3070_v3  ;;  %v448_v57 = vrot.slane %v440_v55, %v3070_v3  ;;  %v757_v12 = vrot.slane %v743_v0, %v3070_v3 }
 0x32c   :  { %2693 = vmatprep.mubr.msk.bf16.mxu1 %vm2911_vm1, %v2910_v15  ;;  %v461_v13 = vpack.c.bf16 %v389_v59, %v389_v59  ;;  %v773_v61 = vrot.slane %v759_v10, %v3070_v3  ;;  %v978_v14 = vcombine.low %v953_v41, %v961_v62  ;;  %v1233_v16 = vsel %vm1090_vm2, %v781_v9, 0 }
 0x32d   :  { %v782_v6 = vpack.c.bf16 %v774_v11, %v774_v11  ;;  %v775_v17 = vcombine.high %v750_v58, %v766_v63  ;;  %v994_v18 = vcombine.low %v969_v7, %v977_v8  ;;  %v456_v20 = vcombine.low %v432_v56, %v448_v57 }
 0x32e   :  { %v776_v23 = vcombine.low %v757_v12, %v773_v61  ;;  %v425_v21 = vcombine.high %v3178_v25, %v3181_v28  ;;  %v391_v24 = vcombine.high %v371_v50, %v387_v1  ;;  %v441_v48 = vcombine.high %v3193_v36, %v3196_v42 }
 0x32f   :  { %2676 = vmatmul.mubr.msk.bf16.vlgmr.msra.gmra.mrb[8].mxu0 %vm1090_vm2, %v461_v13  ;;  %v1279_v19 = vsel %vm1090_vm2, %v782_v6, 0  ;;  %v986_v29 = vrot.slane %v978_v14, %v3070_v3  ;;  %v1002_v22 = vrot.slane %v994_v18, %v3070_v3  ;;  %v979_v30 = vcombine.high %v953_v41, %v961_v62 }
 0x330   :  { %2686 = vmatpush3.bf16.xpose.msra.mxu0 %v1233_v16  ;;  %2687 = vmatprep.mubr.msk.bf16.mxu0 %vm2911_vm1, %v2910_v15  ;;  %v783_v31 = vpack.c.bf16 %v775_v17, %v775_v17  ;;  %v995_v32 = vcombine.high %v969_v7, %v977_v8  ;;  %v464_v33 = vpack.c.bf16 %v456_v20, %v456_v20 }
 0x331   :  { %2692 = vmatpush3.bf16.xpose.msra.mxu1 %v1279_v19  ;;  %2697 = vmatprep.subr.bf16.mxu0 %v2910_v15  ;;  %v784_v34 = vpack.c.bf16 %v776_v23, %v776_v23  ;;  %v993_v25 = vrot.slane %v979_v30, %v3070_v3  ;;  %v463_v28 = vpack.c.bf16 %v391_v24, %v391_v24 }
 0x332   :  { %2703 = vmatprep.subr.bf16.mxu1 %v2910_v15  ;;  %v1009_v35 = vrot.slane %v995_v32, %v3070_v3  ;;  %v439_v43 = vrot.slane %v425_v21, %v3070_v3  ;;  %v455_v36 = vrot.slane %v441_v48, %v3070_v3  ;;  %v1010_v42 = vcombine.low %v986_v29, %v1002_v22 }
 0x333   :  { %v1325_v44 = vsel %vm1090_vm2, %v783_v31, 0  ;;  %v777_v49 = vcombine.high %v757_v12, %v773_v61  ;;  %v1371_v2 = vsel %vm1090_vm2, %v784_v34, 0  ;;  %v457_v4 = vcombine.high %v432_v56, %v448_v57 }
 0x334   :  { %v3249_v50 = vcombine.low %v993_v25, %v1009_v35  ;;  %v3251_v1 = vcombine.high %v993_v25, %v1009_v35  ;;  %v458_v5 = vcombine.low %v439_v43, %v455_v36  ;;  %v1082_v51 = vpack.c.bf16 %v1010_v42, %v1010_v42 }
 0x335   :  { %v785_v26 = vpack.c.bf16 %v777_v49, %v777_v49  ;;  %v465_v27 = vpack.c.bf16 %v457_v4, %v457_v4  ;;  %v1011_v55 = vcombine.high %v986_v29, %v1002_v22  ;;  %v459_v37 = vcombine.high %v439_v43, %v455_v36 }
 0x336   :  { %v466_v52 = vpack.c.bf16 %v458_v5, %v458_v5  ;;  %v1544_v53 = vsel %vm1542_vm3, %v1082_v51, 0 }
 0x337   :  { %2688 = vmatmul.mubr.msk.bf16.vlgmr.msra.gmra.mrb[12].mxu0 %vm1090_vm2, %v463_v28  ;;  %v1417_v54 = vsel %vm1090_vm2, %v785_v26, 0  ;;  %v1083_v38 = vpack.c.bf16 %v1011_v55, %v1011_v55  ;;  %v467_v58 = vpack.c.bf16 %v459_v37, %v459_v37 }
 0x338   :  { %2694 = vmatmul.mubr.msk.bf16.vlgmr.msra.gmra.mrb[4].mxu1 %vm1090_vm2, %v464_v33  ;;  %2698 = vmatpush3.bf16.xpose.msra.mxu0 %v1325_v44 }
 0x339   :  { %2704 = vmatpush3.bf16.xpose.msra.mxu1 %v1371_v2  ;;  %2705 = vmatprep.mubr.msk.bf16.mxu1 %vm2911_vm1, %v2910_v15  ;;  %v1590_v59 = vsel %vm1542_vm3, %v1083_v38, 0 }
 0x33a   :  { %2715 = vmatprep.subr.bf16.mxu1 %v2910_v15  ;;  %2699 = vmatprep.mubr.msk.bf16.mxu0 %vm2911_vm1, %v2910_v15 }
 0x33b   :  { %2709 = vmatprep.subr.bf16.mxu0 %v2910_v15 }
 0x33f   :  { %2700 = vmatmul.mubr.msk.bf16.vlgmr.msra.gmra.mrb[16].mxu0 %vm1090_vm2, %v465_v27 }
 0x340   :  { %2706 = vmatmul.mubr.msk.bf16.vlgmr.msra.gmra.mrb[8].mxu1 %vm1090_vm2, %v466_v52  ;;  %2710 = vmatpush3.bf16.xpose.msra.mxu0 %v1417_v54 }
 0x341   :  { %2716 = vmatpush3.bf16.msra.mxu1 %v1544_v53  ;;  %2711 = vmatprep.mubr.msk.bf16.mxu0 %vm2911_vm1, %v2910_v15 }
 0x342   :  { %2721 = vmatprep.subr.bf16.mxu0 %v2910_v15  ;;  %2717 = vmatprep.mubr.msk.bf16.mxu1 %vm2911_vm1, %v2910_v15 }
 0x343   :  { %2727 = vmatprep.subr.bf16.mxu1 %v2910_v15 }
 0x347   :  { %2712 = vmatmul.mubr.msk.bf16.vlgmr.msra.gmra.mrb[20].mxu0 %vm1090_vm2, %v467_v58 }
 0x348   :  { %2722 = vmatpush3.bf16.msra.mxu0 %v1590_v59  ;;  %2723 = vmatprep.mubr.msk.bf16.mxu0 %vm2911_vm1, %v2910_v15 }
 0x349   :  { %2733 = vmatprep.subr.bf16.mxu0 %v2910_v15 }
 0x3f9   :  { %v1131_v39 = vpop.f32.mrb[4].mxu0 }
 0x3fa   :  { %v2671_v41 = vpop.f32.mrb[5].mxu0  ;;  %v1459_v62 = vsel %vm1090_vm2, %v1131_v39, -inf }
 0x3fb   :  { %1460 = vmax.xlane.f32.xlu0 %v1459_v62  ;;  %v1134_v63 = vpop.f32.mrb[6].mxu0 }
 0x3fc   :  { %v2672_v0 = vpop.f32.mrb[7].mxu0  ;;  %v1085_v63 = vpack.c.bf16 %v3251_v1, %v3251_v1 }
 0x3fe   :  { %v1223_v7 = vpop.f32.mrb[0].mxu1 }
 0x3ff   :  { %v2683_v8 = vpop.f32.mrb[1].mxu1  ;;  %v1465_v9 = vsel %vm1090_vm2, %v1223_v7, -inf }
 0x400   :  { %v1226_v10 = vpop.f32.mrb[2].mxu1  ;;  %1466 = vmax.xlane.f32.xlu0 %v1465_v9 }
 0x401   :  { %v2684_v11 = vpop.f32.mrb[3].mxu1 }
 0x402   :  { %v1177_v56 = vpop.f32.mrb[8].mxu0 }
 0x403   :  { %v2677_v57 = vpop.f32.mrb[9].mxu0  ;;  %v1462_v12 = vsel %vm1090_vm2, %v1177_v56, -inf }
 0x404   :  { %1463 = vmax.xlane.f32.xlu1 %v1462_v12  ;;  %v1180_v13 = vpop.f32.mrb[10].mxu0  ;;  %v1682_v57 = vsel %vm1542_vm3, %v1085_v63, 0 }
 0x405   :  { %v2678_v61 = vpop.f32.mrb[11].mxu0 }
 0x40a   :  { %v1269_v6 = vpop.f32.mrb[12].mxu0 }
 0x40b   :  { %v1315_v14 = vpop.f32.mrb[4].mxu1  ;;  %v2689_v16 = vpop.f32.mrb[13].mxu0  ;;  %v1468_v17 = vsel %vm1090_vm2, %v1269_v6, -inf }
 0x40c   :  { %v2695_v18 = vpop.f32.mrb[5].mxu1  ;;  %v1471_v19 = vsel %vm1090_vm2, %v1315_v14, -inf  ;;  %1469 = vmax.xlane.f32.xlu1 %v1468_v17  ;;  %v1272_v20 = vpop.f32.mrb[14].mxu0 }
 0x40d   :  { %v1318_v23 = vpop.f32.mrb[6].mxu1  ;;  %1472 = vmax.xlane.f32.xlu0 %v1471_v19  ;;  %v2690_v21 = vpop.f32.mrb[15].mxu0 }
 0x40e   :  { %v2696_v24 = vpop.f32.mrb[7].mxu1 }
 0x412   :  { %v3281_v48 = vpop.f32.mrb[16].mxu0 }
 0x413   :  { %v3283_v29 = vpop.f32.mrb[8].mxu1  ;;  %v2701_v22 = vpop.f32.mrb[17].mxu0  ;;  %v1474_v30 = vsel %vm1090_vm2, %v3281_v48, -inf }
 0x414   :  { %v2707_v31 = vpop.f32.mrb[9].mxu1  ;;  %1475 = vmax.xlane.f32.xlu0 %v1474_v30  ;;  %v1364_v32 = vpop.f32.mrb[18].mxu0  ;;  %v1477_v42 = vsel %vm1090_vm2, %v3283_v29, -inf }
 0x415   :  { %v1410_v33 = vpop.f32.mrb[10].mxu1  ;;  %v2702_v34 = vpop.f32.mrb[19].mxu0 }
 0x416   :  { %v2708_v25 = vpop.f32.mrb[11].mxu1 }
 0x41a   :  { %v3287_v28 = vpop.f32.mrb[20].mxu0 }
 0x41b   :  { %v2713_v35 = vpop.f32.mrb[21].mxu0  ;;  %v1480_v44 = vsel %vm1090_vm2, %v3287_v28, -inf }
 0x41c   :  { %v1456_v43 = vpop.f32.mrb[22].mxu0 }
 0x41d   :  { %792 = vrot.lane.b32.xlu1 %v3046_v45, %s2916_s4  ;;  %v2714_v36 = vpop.f32.mrb[23].mxu0 }
 0x421   :  { %796 = vrot.lane.b32.xlu1 %v3050_v46, %s2916_s4 }
 0x425   :  { %800 = vrot.lane.b32.xlu1 %v3052_v47, %s2916_s4 }
 0x42a   :  { %788 = vrot.lane.b32.xlu0 %v3032_v40, %s2916_s4  ;;  %v1084_v40 = vpack.c.bf16 %v3249_v50, %v3249_v50 }
 0x42c   :  { %v1636_v58 = vsel %vm1542_vm3, %v1084_v40, 0 }
 0x449   :  { %1478 = vmax.xlane.f32.xlu0 %v1477_v42  ;;  %1481 = vmax.xlane.f32.xlu1 %v1480_v44 }
 0x488   :  { %v1461_v49 = vpop.xlane.xlu0 %1460 }
 0x489   :  { %v1483_v45 = vsub.f32 %v1131_v39, %v1461_v49 }
 0x48b   :  { %v1491_v2 = vmul.f32 1.442695, %v1483_v45 }
 0x48d   :  { %v1467_v4 = vpop.xlane.xlu0 %1466  ;;  %2846 = vpow2.f32 %v1491_v2 }
 0x48e   :  { %v1485_v46 = vsub.f32 %v1223_v7, %v1467_v4 }
 0x490   :  { %v1495_v5 = vmul.f32 1.442695, %v1485_v46 }
 0x491   :  { %v1464_v51 = vpop.xlane.xlu1 %1463 }
 0x492   :  { %2848 = vpow2.f32 %v1495_v5  ;;  %v1484_v47 = vsub.f32 %v1177_v56, %v1464_v51 }
 0x494   :  { %v1493_v26 = vmul.f32 1.442695, %v1484_v47 }
 0x496   :  { %2850 = vpow2.f32 %v1493_v26 }
 0x497   :  { %v2847_v27 = vpop.eup %2846 }
 0x498   :  { %v1507_v53 = vsel %vm1090_vm2, %v2847_v27, 0.0  ;;  %v1531_v54 = vpack.c.bf16 %v2847_v27, %v2847_v27 }
 0x499   :  { %v1470_v52 = vpop.xlane.xlu1 %1469  ;;  %1508 = vadd.xlane.f32.xlu0 %v1507_v53 }
 0x49a   :  { %v1473_v55 = vpop.xlane.xlu0 %1472  ;;  %v1486_v37 = vsub.f32 %v1269_v6, %v1470_v52  ;;  %2718 = vmatmul.mubr.msk.bf16.vlgmr.msra.gmra.mrb[12].mxu1 %vm1090_vm2, %v1531_v54 }
 0x49b   :  { %v1487_v38 = vsub.f32 %v1315_v14, %v1473_v55  ;;  %2728 = vmatpush3.bf16.msra.mxu1 %v1636_v58  ;;  %2729 = vmatprep.mubr.msk.bf16.mxu1 %vm2911_vm1, %v2910_v15 }
 0x49c   :  { %v2849_v59 = vpop.eup %2848  ;;  %v1497_v39 = vmul.f32 1.442695, %v1486_v37  ;;  %2739 = vmatprep.subr.bf16.mxu1 %v2910_v15 }
 0x49d   :  { %v1499_v50 = vmul.f32 1.442695, %v1487_v38  ;;  %v793_v41 = vpop.permute.xlu1 %792  ;;  %v1513_v62 = vsel %vm1090_vm2, %v2849_v59, 0.0  ;;  %v1533_v11 = vpack.c.bf16 %v2849_v59, %v2849_v59 }
 0x49e   :  { %2852 = vpow2.f32 %v1497_v39  ;;  %1514 = vadd.xlane.f32.xlu0 %v1513_v62 }
 0x49f   :  { %2854 = vpow2.f32 %v1499_v50 }
 0x4a0   :  { %v2851_v0 = vpop.eup %2850 }
 0x4a1   :  { %v797_v7 = vpop.permute.xlu1 %796  ;;  %v1476_v8 = vpop.xlane.xlu0 %1475  ;;  %v1510_v9 = vsel %vm1090_vm2, %v2851_v0, 0.0  ;;  %v1532_v10 = vpack.c.bf16 %v2851_v0, %v2851_v0 }
 0x4a2   :  { %v1488_v56 = vsub.f32 %v3281_v48, %v1476_v8  ;;  %1511 = vadd.xlane.f32.xlu0 %v1510_v9  ;;  %2730 = vmatmul.mubr.msk.bf16.vlgmr.msra.gmra.mrb[16].mxu1 %vm1090_vm2, %v1533_v11 }
 0x4a3   :  { %2724 = vmatmul.mubr.msk.bf16.vlgmr.msra.gmra.mrb[24].mxu0 %vm1090_vm2, %v1532_v10  ;;  %2741 = vmatprep.mubr.msk.bf16.mxu1 %vm2911_vm1, %v2910_v15 }
 0x4a4   :  { %v1501_v12 = vmul.f32 1.442695, %v1488_v56  ;;  %2734 = vmatpush3.bf16.msra.mxu0 %v1682_v57  ;;  %2735 = vmatprep.mubr.msk.bf16.mxu0 %vm2911_vm1, %v2910_v15 }
 0x4a5   :  { %v801_v1 = vpop.permute.xlu1 %800  ;;  %v789_v13 = vpop.permute.xlu0 %788  ;;  %2745 = vmatprep.subr.bf16.mxu0 %v2910_v15 }
 0x4a6   :  { %2856 = vpow2.f32 %v1501_v12  ;;  %v894_v61 = vcombine.low %v793_v41, %v801_v1  ;;  %v895_v6 = vcombine.high %v793_v41, %v801_v1  ;;  %v878_v14 = vcombine.low %v789_v13, %v797_v7 }
 0x4a7   :  { %v879_v16 = vcombine.high %v789_v13, %v797_v7 }
 0x4a8   :  { %v2853_v17 = vpop.eup %2852  ;;  %v902_v18 = vrot.slane %v894_v61, %v3068_v60  ;;  %v909_v19 = vrot.slane %v895_v6, %v3068_v60  ;;  %v886_v20 = vrot.slane %v878_v14, %v3068_v60 }
 0x4a9   :  { %v2855_v23 = vpop.eup %2854  ;;  %v893_v21 = vrot.slane %v879_v16, %v3068_v60  ;;  %v1516_v24 = vsel %vm1090_vm2, %v2853_v17, 0.0  ;;  %v1534_v48 = vpack.c.bf16 %v2853_v17, %v2853_v17 }
 0x4aa   :  { %v910_v22 = vcombine.low %v886_v20, %v902_v18  ;;  %v911_v30 = vcombine.high %v886_v20, %v902_v18  ;;  %v1519_v31 = vsel %vm1090_vm2, %v2855_v23, 0.0  ;;  %1517 = vadd.xlane.f32.xlu1 %v1516_v24  ;;  %v1535_v7 = vpack.c.bf16 %v2855_v23, %v2855_v23 }
 0x4ab   :  { %v926_v32 = vcombine.low %v893_v21, %v909_v19  ;;  %v927_v33 = vcombine.high %v893_v21, %v909_v19  ;;  %1520 = vadd.xlane.f32.xlu0 %v1519_v31  ;;  %2736 = vmatmul.mubr.msk.bf16.vlgmr.msra.gmra.mrb[28].mxu0 %vm1090_vm2, %v1534_v48 }
 0x4ac   :  { %v918_v34 = vrot.slane %v910_v22, %v3070_v3  ;;  %v925_v25 = vrot.slane %v911_v30, %v3070_v3  ;;  %2747 = vmatprep.mubr.msk.bf16.mxu0 %vm2911_vm1, %v2910_v15 }
 0x4ad   :  { %v934_v35 = vrot.slane %v926_v32, %v3070_v3  ;;  %v941_v43 = vrot.slane %v927_v33, %v3070_v3 }
 0x4ae   :  { %v1014_v36 = vcombine.low %v918_v34, %v925_v25  ;;  %v2568_v42 = vcombine.high %v918_v34, %v925_v25 }
 0x4af   :  { %v1030_v44 = vcombine.low %v934_v35, %v941_v43  ;;  %v2569_v49 = vcombine.high %v934_v35, %v941_v43 }
 0x4b0   :  { %v2857_v45 = vpop.eup %2856  ;;  %v1021_v2 = vrot.slane %v1014_v36, %v3068_v60  ;;  %v1029_v4 = vrot.slane %v2568_v42, %v3068_v60 }
 0x4b1   :  { %v1037_v46 = vrot.slane %v1030_v44, %v3068_v60  ;;  %v1045_v5 = vrot.slane %v2569_v49, %v3068_v60  ;;  %v1522_v51 = vsel %vm1090_vm2, %v2857_v45, 0.0  ;;  %v1536_v8 = vpack.c.bf16 %v2857_v45, %v2857_v45 }
 0x4b2   :  { %1523 = vadd.xlane.f32.xlu1 %v1522_v51  ;;  %v1046_v47 = vcombine.low %v1021_v2, %v1029_v4  ;;  %v1047_v26 = vcombine.high %v1021_v2, %v1029_v4 }
 0x4b3   :  { %v1062_v40 = vcombine.low %v1037_v46, %v1045_v5  ;;  %v1063_v27 = vcombine.high %v1037_v46, %v1045_v5 }
 0x4b4   :  { %v1054_v52 = vrot.slane %v1046_v47, %v3070_v3  ;;  %v1061_v53 = vrot.slane %v1047_v26, %v3070_v3 }
 0x4b5   :  { %v1070_v54 = vrot.slane %v1062_v40, %v3070_v3  ;;  %v1077_v55 = vrot.slane %v1063_v27, %v3070_v3 }
 0x4b7   :  { %v1078_v37 = vcombine.low %v1054_v52, %v1070_v54  ;;  %v1079_v38 = vcombine.high %v1054_v52, %v1070_v54  ;;  %v1080_v58 = vcombine.low %v1061_v53, %v1077_v55  ;;  %v1081_v59 = vcombine.high %v1061_v53, %v1077_v55 }
 0x4b9   :  { %v1086_v39 = vpack.c.bf16 %v1078_v37, %v1078_v37  ;;  %v1087_v50 = vpack.c.bf16 %v1079_v38, %v1079_v38  ;;  %v1088_v63 = vpack.c.bf16 %v1080_v58, %v1080_v58  ;;  %v1089_v0 = vpack.c.bf16 %v1081_v59, %v1081_v59 }
 0x4bb   :  { %v1728_v41 = vsel %vm1542_vm3, %v1086_v39, 0  ;;  %v1774_v62 = vsel %vm1542_vm3, %v1087_v50, 0  ;;  %v1820_v9 = vsel %vm1542_vm3, %v1088_v63, 0  ;;  %v1866_v10 = vsel %vm1542_vm3, %v1089_v0, 0 }
 0x4bc   :  { %2740 = vmatpush3.bf16.msra.mxu1 %v1728_v41  ;;  %2746 = vmatpush3.bf16.msra.mxu0 %v1774_v62 }
 0x4bd   :  { %2751 = vmatprep.subr.bf16.mxu1 %v2910_v15  ;;  %2757 = vmatprep.subr.bf16.mxu0 %v2910_v15 }
 0x4bf   :  { %2742 = vmatmul.mubr.msk.bf16.vlgmr.msra.gmra.mrb[20].mxu1 %vm1090_vm2, %v1535_v7  ;;  %2748 = vmatmul.mubr.msk.bf16.vlgmr.msra.gmra.mrb[32].mxu0 %vm1090_vm2, %v1536_v8 }
 0x4c0   :  { %2752 = vmatpush3.bf16.msra.mxu1 %v1820_v9  ;;  %2758 = vmatpush3.bf16.msra.mxu0 %v1866_v10 }
 0x4c1   :  { %2753 = vmatprep.mubr.msk.bf16.mxu1 %vm2911_vm1, %v2910_v15  ;;  %2759 = vmatprep.mubr.msk.bf16.mxu0 %vm2911_vm1, %v2910_v15 }
 0x4c2   :  { %2763 = vmatprep.subr.bf16.mxu1 %v2910_v15  ;;  %2771 = vmatprep.subr.bf16.mxu0 %v2910_v15 }
 0x4d6   :  { %v1479_v11 = vpop.xlane.xlu0 %1478  ;;  %v1482_v56 = vpop.xlane.xlu1 %1481 }
 0x4d7   :  { %v1489_v57 = vsub.f32 %v3283_v29, %v1479_v11  ;;  %v1490_v12 = vsub.f32 %v3287_v28, %v1482_v56 }
 0x4d9   :  { %v1503_v1 = vmul.f32 1.442695, %v1489_v57  ;;  %v1505_v13 = vmul.f32 1.442695, %v1490_v12 }
 0x4db   :  { %2858 = vpow2.f32 %v1503_v1 }
 0x4dc   :  { %2860 = vpow2.f32 %v1505_v13 }
 0x4e5   :  { %v2859_v61 = vpop.eup %2858 }
 0x4e6   :  { %v2861_v6 = vpop.eup %2860  ;;  %v1525_v14 = vsel %vm1090_vm2, %v2859_v61, 0.0  ;;  %v1537_v16 = vpack.c.bf16 %v2859_v61, %v2859_v61 }
 0x4e7   :  { %1526 = vadd.xlane.f32.xlu0 %v1525_v14  ;;  %v1528_v17 = vsel %vm1090_vm2, %v2861_v6, 0.0  ;;  %v1538_v18 = vpack.c.bf16 %v2861_v6, %v2861_v6 }
 0x4e8   :  { %1529 = vadd.xlane.f32.xlu1 %v1528_v17  ;;  %2754 = vmatmul.mubr.msk.bf16.vlgmr.msra.gmra.mrb[24].mxu1 %vm1090_vm2, %v1537_v16 }
 0x4e9   :  { %2760 = vmatmul.mubr.msk.bf16.vlgmr.msra.gmra.mrb[36].mxu0 %vm1090_vm2, %v1538_v18  ;;  %2767 = vmatprep.mubr.msk.bf16.mxu1 %vm2911_vm1, %v2910_v15 }
 0x4ea   :  { %2775 = vmatprep.mubr.msk.bf16.mxu0 %vm2911_vm1, %v2910_v15 }
 0x526   :  { %v1509_v29 = vpop.xlane.xlu0 %1508 }
 0x527   :  { %2862 = vrcp.f32 %v1509_v29 }
 0x52b   :  { %v1515_v28 = vpop.xlane.xlu0 %1514 }
 0x52c   :  { %2864 = vrcp.f32 %v1515_v28 }
 0x52f   :  { %v1512_v23 = vpop.xlane.xlu0 %1511 }
 0x530   :  { %2866 = vrcp.f32 %v1512_v23 }
 0x531   :  { %v2863_v22 = vpop.eup %2862 }
 0x536   :  { %v2865_v30 = vpop.eup %2864 }
 0x537   :  { %v1518_v24 = vpop.xlane.xlu1 %1517 }
 0x538   :  { %2868 = vrcp.f32 %v1518_v24 }
 0x53a   :  { %v2867_v2 = vpop.eup %2866 }
 0x542   :  { %v2869_v4 = vpop.eup %2868 }
 0x56d   :  { %v1580_v19 = vpop.f32.mrb[12].mxu1 }
 0x56e   :  { %v2719_v20 = vpop.f32.mrb[13].mxu1  ;;  %v1916_v33 = vmul.f32 %v2863_v22, %v1580_v19 }
 0x56f   :  { %v1583_v21 = vpop.f32.mrb[14].mxu1 }
 0x570   :  { %v2720_v48 = vpop.f32.mrb[15].mxu1 }
 0x575   :  { %v1672_v32 = vpop.f32.mrb[16].mxu1 }
 0x576   :  { %v1626_v31 = vpop.f32.mrb[24].mxu0  ;;  %v1918_v34 = vmul.f32 %v2865_v30, %v1672_v32  ;;  %v2731_v35 = vpop.f32.mrb[17].mxu1 }
 0x577   :  { %v2725_v25 = vpop.f32.mrb[25].mxu0  ;;  %v1675_v36 = vpop.f32.mrb[18].mxu1  ;;  %v1917_v5 = vmul.f32 %v2867_v2, %v1626_v31 }
 0x578   :  { %v1629_v43 = vpop.f32.mrb[26].mxu0  ;;  %v1924_v42 = vcombine.low %v1916_v33, %v1918_v34  ;;  %v1925_v44 = vcombine.high %v1916_v33, %v1918_v34  ;;  %v2732_v45 = vpop.f32.mrb[19].mxu1 }
 0x579   :  { %v2726_v49 = vpop.f32.mrb[27].mxu0  ;;  %v1521_v32 = vpop.xlane.xlu0 %1520 }
 0x57a   :  { %v1932_v53 = vrot.slane %v1924_v42, %v3068_v60  ;;  %v1939_v54 = vrot.slane %v1925_v44, %v3068_v60  ;;  %v1524_v33 = vpop.xlane.xlu1 %1523  ;;  %2870 = vrcp.f32 %v1521_v32  ;;  %v2831_v32 = vld [vmem:[%s3536_s5 + $0x8] sm:$0xff]  }
 0x57b   :  { %2872 = vrcp.f32 %v1524_v33 }
 0x57d   :  { %v1527_v34 = vpop.xlane.xlu0 %1526 }
 0x57e   :  { %v1718_v46 = vpop.f32.mrb[28].mxu0  ;;  %v1530_v25 = vpop.xlane.xlu1 %1529  ;;  %2874 = vrcp.f32 %v1527_v34 }
 0x57f   :  { %v1919_v51 = vmul.f32 %v2869_v4, %v1718_v46  ;;  %v2737_v47 = vpop.f32.mrb[29].mxu0  ;;  %2876 = vrcp.f32 %v1530_v25 }
 0x580   :  { %v1721_v26 = vpop.f32.mrb[30].mxu0 }
 0x581   :  { %v1940_v40 = vcombine.low %v1917_v5, %v1919_v51  ;;  %v1941_v27 = vcombine.high %v1917_v5, %v1919_v51  ;;  %v2738_v52 = vpop.f32.mrb[31].mxu0 }
 0x583   :  { %v1948_v55 = vrot.slane %v1940_v40, %v3068_v60  ;;  %v1955_v37 = vrot.slane %v1941_v27, %v3068_v60 }
 0x584   :  { %v2871_v35 = vpop.eup %2870 }
 0x585   :  { %v1956_v38 = vcombine.low %v1932_v53, %v1948_v55  ;;  %v1957_v58 = vcombine.high %v1932_v53, %v1948_v55  ;;  %v1972_v59 = vcombine.low %v1939_v54, %v1955_v37  ;;  %v1973_v39 = vcombine.high %v1939_v54, %v1955_v37  ;;  %v2873_v43 = vpop.eup %2872 }
 0x587   :  { %v1964_v50 = vrot.slane %v1956_v38, %v3070_v3  ;;  %v1971_v41 = vrot.slane %v1957_v58, %v3070_v3  ;;  %v1980_v62 = vrot.slane %v1972_v59, %v3070_v3  ;;  %v1987_v63 = vrot.slane %v1973_v39, %v3070_v3 }
 0x588   :  { %v2875_v36 = vpop.eup %2874 }
 0x589   :  { %v2060_v0 = vcombine.low %v1964_v50, %v1971_v41  ;;  %v2586_v7 = vcombine.high %v1964_v50, %v1971_v41  ;;  %v2076_v8 = vcombine.low %v1980_v62, %v1987_v63  ;;  %v2587_v9 = vcombine.high %v1980_v62, %v1987_v63  ;;  %v2877_v44 = vpop.eup %2876 }
 0x58b   :  { %v2067_v10 = vrot.slane %v2060_v0, %v3068_v60  ;;  %v2075_v11 = vrot.slane %v2586_v7, %v3068_v60  ;;  %v2083_v56 = vrot.slane %v2076_v8, %v3068_v60  ;;  %v2091_v57 = vrot.slane %v2587_v9, %v3068_v60 }
 0x58d   :  { %v2093_v12 = vcombine.high %v2067_v10, %v2075_v11  ;;  %v2109_v1 = vcombine.high %v2083_v56, %v2091_v57  ;;  %v2092_v13 = vcombine.low %v2067_v10, %v2075_v11  ;;  %v2108_v61 = vcombine.low %v2083_v56, %v2091_v57  ;;  %v2830_v57 = vld [vmem:[%s3536_s5] sm:$0xff]   ;;  %s2919_s5 = smov 16  }
 0x58e   :  { %2764 = vmatpush3.bf16.msra.mxu1 %v2830_v57 }
 0x58f   :  { %v3381_v6 = vrot.slane %v2093_v12, %v3070_v3  ;;  %v3384_v14 = vrot.slane %v2109_v1, %v3070_v3  ;;  %v3387_v16 = vrot.slane %v2092_v13, %v3070_v3  ;;  %v3390_v17 = vrot.slane %v2108_v61, %v3070_v3  ;;  %2765 = vmatprep.subr.bf16.mxu1 %v2910_v15 }
 0x591   :  { %v2126_v18 = vcombine.low %v3381_v6, %v3384_v14  ;;  %v2124_v29 = vcombine.low %v3387_v16, %v3390_v17  ;;  %v2125_v28 = vcombine.high %v3387_v16, %v3390_v17  ;;  %v2127_v19 = vcombine.high %v3381_v6, %v3384_v14  ;;  %v2590_v16 = vld [vmem:[%s3537_s6] ss:$0 sm:$0xff] }
 0x592   :  { %v1764_v20 = vpop.f32.mrb[20].mxu1  ;;  %v1810_v23 = vpop.f32.mrb[32].mxu0  ;;  %2766 = vmatpush3.bf16.msra.mxu1 %v2831_v32 }
 0x593   :  { %v2743_v21 = vpop.f32.mrb[21].mxu1  ;;  %v2749_v24 = vpop.f32.mrb[33].mxu0  ;;  %v1920_v49 = vmul.f32 %v2871_v35, %v1764_v20  ;;  %v1921_v46 = vmul.f32 %v2873_v43, %v1810_v23  ;;  %2779 = vmatprep.subr.bf16.mxu1 %v2910_v15 }
 0x594   :  { %v1767_v48 = vpop.f32.mrb[22].mxu1  ;;  %v1813_v22 = vpop.f32.mrb[34].mxu0 }
 0x595   :  { %v2744_v30 = vpop.f32.mrb[23].mxu1  ;;  %v2750_v31 = vpop.f32.mrb[35].mxu0 }
 0x5bb   :  { %v1856_v42 = vpop.f32.mrb[24].mxu1 }
 0x5bc   :  { %v1922_v45 = vmul.f32 %v2875_v36, %v1856_v42  ;;  %v1902_v2 = vpop.f32.mrb[36].mxu0  ;;  %v2755_v4 = vpop.f32.mrb[25].mxu1 }
 0x5bd   :  { %v1923_v5 = vmul.f32 %v2877_v44, %v1902_v2  ;;  %v2761_v51 = vpop.f32.mrb[37].mxu0  ;;  %v1859_v47 = vpop.f32.mrb[26].mxu1 }
 0x5be   :  { %v1992_v26 = vcombine.low %v1920_v49, %v1922_v45  ;;  %v1993_v40 = vcombine.high %v1920_v49, %v1922_v45  ;;  %v1905_v27 = vpop.f32.mrb[38].mxu0  ;;  %v2756_v52 = vpop.f32.mrb[27].mxu1 }
 0x5bf   :  { %v2008_v53 = vcombine.low %v1921_v46, %v1923_v5  ;;  %v2009_v54 = vcombine.high %v1921_v46, %v1923_v5  ;;  %v2762_v55 = vpop.f32.mrb[39].mxu0  ;;  %v2884_v27 = vld [vmem:[%s3531_s0] sm:$0xff] }
 0x5c0   :  { %v2000_v37 = vrot.slane %v1992_v26, %v3068_v60  ;;  %v2007_v38 = vrot.slane %v1993_v40, %v3068_v60  ;;  %v2885_v55 = vld [vmem:[%s3531_s0 + $0x8] sm:$0xff]  ;;  %s2922_s0 = smov [#allocation2]  }
 0x5c1   :  { %v2016_v58 = vrot.slane %v2008_v53, %v3068_v60  ;;  %v2023_v59 = vrot.slane %v2009_v54, %v3068_v60  ;;  %s2541_s6 = sshll.u32 %s2922_s0, 4  ;;  %s2542_s6 = int_to_ptr.vmem [resolvable:$true] %s2541_s6 }
 0x5c2   :  { %s2886_s17 = scalar_lea.vmem %s2542_s6, 256  ;;  %p2891_p1 = scmp.lt.s32.totalorder %s2542_s6, %s2542_s6 }
 0x5c3   :  { %v2024_v39 = vcombine.low %v2000_v37, %v2016_v58  ;;  %v2025_v50 = vcombine.high %v2000_v37, %v2016_v58  ;;  %v2040_v41 = vcombine.low %v2007_v38, %v2023_v59  ;;  %v2041_v62 = vcombine.high %v2007_v38, %v2023_v59  ;;  %p2887_p0 = scmp.ne.s32.totalorder %s2542_s6, %s2886_s17  ;;  %p2892_p2 = scmp.lt.s32.totalorder %s2886_s17, %s2886_s17 }
 0x5c5   :  { %v2032_v63 = vrot.slane %v2024_v39, %v3070_v3  ;;  %v2039_v0 = vrot.slane %v2025_v50, %v3070_v3  ;;  %v2048_v7 = vrot.slane %v2040_v41, %v3070_v3  ;;  %v2055_v8 = vrot.slane %v2041_v62, %v3070_v3  ;;  %p2893_p3 = por %p2892_p2, %p2891_p1 }
 0x5c7   :  { %v2128_v9 = vcombine.low %v2032_v63, %v2039_v0  ;;  %v2588_v10 = vcombine.high %v2032_v63, %v2039_v0  ;;  %v2144_v11 = vcombine.low %v2048_v7, %v2055_v8  ;;  %v2589_v56 = vcombine.high %v2048_v7, %v2055_v8  ;;  %p2894_p4 = pnand %p2893_p3, %p2887_p0 }
 0x5c9   :  { %v2135_v12 = vrot.slane %v2128_v9, %v3068_v60  ;;  %v2143_v1 = vrot.slane %v2588_v10, %v3068_v60  ;;  %v2151_v13 = vrot.slane %v2144_v11, %v3068_v60  ;;  %v2159_v61 = vrot.slane %v2589_v56, %v3068_v60  ;;  %v2832_v10 = vld [vmem:[%s3540_s9] sm:$0xff]   ;;  %v2833_v11 = vld [vmem:[%s3540_s9 + $0x8] sm:$0xff]  }
 0x5ca   :  { %2772 = vmatpush3.bf16.msra.mxu0 %v2832_v10 }
 0x5cb   :  { %v2161_v20 = vcombine.high %v2135_v12, %v2143_v1  ;;  %v2177_v23 = vcombine.high %v2151_v13, %v2159_v61  ;;  %v2160_v21 = vcombine.low %v2135_v12, %v2143_v1  ;;  %v2176_v24 = vcombine.low %v2151_v13, %v2159_v61  ;;  %2773 = vmatprep.subr.bf16.mxu0 %v2910_v15 }
 0x5cd   :  { %v2175_v48 = vrot.slane %v2161_v20, %v3070_v3  ;;  %v2191_v22 = vrot.slane %v2177_v23, %v3070_v3  ;;  %v2168_v30 = vrot.slane %v2160_v21, %v3070_v3  ;;  %v2184_v31 = vrot.slane %v2176_v24, %v3070_v3  ;;  %v2594_v21 = vld [vmem:[%s3538_s7] ss:$0 sm:$0xff] }
 0x5ce   :  { %2774 = vmatpush3.bf16.msra.mxu0 %v2833_v11 }
 0x5cf   :  { %v2194_v60 = vcombine.low %v2175_v48, %v2191_v22  ;;  %v2193_v33 = vcombine.high %v2168_v30, %v2184_v31  ;;  %v2192_v34 = vcombine.low %v2168_v30, %v2184_v31  ;;  %v2195_v25 = vcombine.high %v2175_v48, %v2191_v22  ;;  %v2595_v30 = vld [vmem:[%s3539_s8] ss:$0 sm:$0xff] }
 0x5d1   :  { %v2818_v35 = vpack.i.bf16 %v2194_v60, %v2126_v18  ;;  %v2813_v43 = vpack.i.bf16 %v2193_v33, %v2125_v28  ;;  %v2823_v3 = vpack.i.bf16 %v2195_v25, %v2127_v19  ;;  %v2835_v25 = vld [vmem:[%s3542_s11 + $0x8] sm:$0xff]  }
 0x5d3   :  { %2819 = vrot.lane.b32.xlu1 %v2818_v35, %s2919_s5  ;;  %2814 = vrot.lane.b32.xlu0 %v2813_v43, %s2920_s27  ;;  %v2836_v35 = vld [vmem:[%s3542_s11 + $0x10] sm:$0xff]   ;;  %v2837_v43 = vld [vmem:[%s3542_s11 + $0x18] sm:$0xff]  }
 0x5d7   :  { %2824 = vrot.lane.b32.xlu1 %v2823_v3, %s2921_s28  ;;  %v2838_v3 = vld [vmem:[%s3542_s11 + $0x20] sm:$0xff]  }
 0x645   :  { %v2820_v36 = vpop.permute.xlu1 %2819  ;;  %v2815_v42 = vpop.permute.xlu0 %2814 }
 0x646   :  { %v2817_v44 = vunpack.i.h.bf16 %v2815_v42  ;;  %v2816_v49 = vunpack.i.l.bf16 %v2815_v42  ;;  %v2822_v18 = vunpack.i.h.bf16 %v2820_v36  ;;  %v2821_v45 = vunpack.i.l.bf16 %v2820_v36  ;;  %v2839_v36 = vld [vmem:[%s3542_s11 + $0x28] sm:$0xff]   ;;  %v2840_v42 = vld [vmem:[%s3542_s11 + $0x30] sm:$0xff]  }
 0x648   :  { %v2220_v28 = vsel %vm1090_vm2, %v2124_v29, %v2816_v49  ;;  %v2221_v6 = vsel %vm1090_vm2, %v2192_v34, %v2817_v44  ;;  %v2834_v34 = vld [vmem:[%s3542_s11] sm:$0xff]   ;;  %v2841_v44 = vld [vmem:[%s3542_s11 + $0x38] sm:$0xff]  }
 0x649   :  { %v2825_v14 = vpop.permute.xlu1 %2824  ;;  %v2223_v4 = vsel %vm2222_vm4, %v2220_v28, %v2821_v45  ;;  %v2224_v46 = vsel %vm2222_vm4, %v2221_v6, %v2822_v18  ;;  %v2596_v49 = vld [vmem:[%s3541_s10] ss:$0 sm:$0xff] }
 0x64a   :  { %v2827_v19 = vunpack.i.h.bf16 %v2825_v14  ;;  %v2826_v2 = vunpack.i.l.bf16 %v2825_v14 }
 0x64c   :  { %v2226_v5 = vsel %vm2225_vm5, %v2223_v4, %v2826_v2  ;;  %v2227_v51 = vsel %vm2225_vm5, %v2224_v46, %v2827_v19 }
 0x64d   :  { %v2228_v47 = vpack.c.bf16 %v2227_v51, %v2226_v5 }
 0x64f   :  { %2768 = vmatmul.mubr.msk.bf16.vlgmr.msra.gmra.mrb[28].mxu1 %vm54_vm0, %v2228_v47 }
 0x650   :  { %2795 = vmatprep.mubr.msk.bf16.mxu1 %vm2911_vm1, %v2910_v15  ;;  %2780 = vmatpush3.bf16.msra.mxu1 %v2834_v34 }
 0x651   :  { %2781 = vmatprep.subr.bf16.mxu1 %v2910_v15 }
 0x654   :  { %2782 = vmatpush3.bf16.msra.mxu1 %v2835_v25 }
 0x655   :  { %2783 = vmatprep.subr.bf16.mxu1 %v2910_v15 }
 0x658   :  { %2784 = vmatpush3.bf16.msra.mxu1 %v2836_v35 }
 0x659   :  { %2785 = vmatprep.subr.bf16.mxu1 %v2910_v15 }
 0x65c   :  { %2786 = vmatpush3.bf16.msra.mxu1 %v2837_v43 }
 0x65d   :  { %2787 = vmatprep.subr.bf16.mxu1 %v2910_v15 }
 0x660   :  { %2788 = vmatpush3.bf16.msra.mxu1 %v2838_v3 }
 0x661   :  { %2789 = vmatprep.subr.bf16.mxu1 %v2910_v15 }
 0x664   :  { %2790 = vmatpush3.bf16.msra.mxu1 %v2839_v36 }
 0x665   :  { %2791 = vmatprep.subr.bf16.mxu1 %v2910_v15 }
 0x668   :  { %2792 = vmatpush3.bf16.msra.mxu1 %v2840_v42 }
 0x669   :  { %2793 = vmatprep.subr.bf16.mxu1 %v2910_v15 }
 0x66c   :  { %2794 = vmatpush3.bf16.msra.mxu1 %v2841_v44 }
 0x722   :  { %v2289_v17 = vpop.f32.mrb[28].mxu1 }
 0x723   :  { %v2290_v29 = vadd.f32 %v2590_v16, %v2289_v17  ;;  %v2769_v26 = vpop.f32.mrb[29].mxu1 }
 0x724   :  { %v2292_v40 = vpop.f32.mrb[30].mxu1  ;;  %v2600_v26 = vld [vmem:[%s3543_s12] ss:$0 sm:$0xff] }
 0x725   :  { %v3448_v52 = vadd.f32 %v2884_v27, %v2290_v29  ;;  %v2293_v53 = vadd.f32 %v2590_v16, %v2292_v40  ;;  %v2770_v54 = vpop.f32.mrb[31].mxu1 }
 0x727   :  { %v3453_v37 = vadd.f32 %v2885_v55, %v2293_v53  ;;  %v2300_v38 = vsel %vm54_vm0, %v3448_v52, 0.0 }
 0x728   :  { %2301 = vadd.xlane.f32.xlu1 %v2300_v38 }
 0x729   :  { %v2303_v58 = vsel %vm54_vm0, %v3453_v37, 0.0 }
 0x72a   :  { %2304 = vadd.xlane.f32.xlu0 %v2303_v58 }
 0x7b5   :  { %v2302_v59 = vpop.xlane.xlu1 %2301 }
 0x7b6   :  { %v2306_v39 = vmul.f32 0.03125, %v2302_v59 }
 0x7b7   :  { %v2305_v50 = vpop.xlane.xlu0 %2304 }
 0x7b8   :  { %v2308_v41 = vsub.f32 %v3448_v52, %v2306_v39  ;;  %v2307_v62 = vmul.f32 0.03125, %v2305_v50 }
 0x7ba   :  { %v2309_v63 = vsub.f32 %v3453_v37, %v2307_v62  ;;  %v2310_v0 = vmul.f32 %v2308_v41, %v2308_v41 }
 0x7bc   :  { %v2312_v7 = vsel %vm54_vm0, %v2310_v0, 0.0  ;;  %v2311_v8 = vmul.f32 %v2309_v63, %v2309_v63 }
 0x7bd   :  { %2313 = vadd.xlane.f32.xlu0 %v2312_v7 }
 0x7be   :  { %v2315_v9 = vsel %vm54_vm0, %v2311_v8, 0.0 }
 0x7c1   :  { %2316 = vadd.xlane.f32.xlu0 %v2315_v9 }
 0x84a   :  { %v2314_v56 = vpop.xlane.xlu0 %2313 }
 0x84b   :  { %v2318_v57 = vmul.f32 0.03125, %v2314_v56 }
 0x84d   :  { %v2320_v12 = vadd.f32 1e-05, %v2318_v57 }
 0x84e   :  { %v2317_v1 = vpop.xlane.xlu0 %2316 }
 0x84f   :  { %2878 = vrsqrt.f32 %v2320_v12  ;;  %v2319_v13 = vmul.f32 0.03125, %v2317_v1 }
 0x851   :  { %v2321_v61 = vadd.f32 1e-05, %v2319_v13 }
 0x853   :  { %2880 = vrsqrt.f32 %v2321_v61 }
 0x859   :  { %v2879_v20 = vpop.eup %2878 }
 0x85a   :  { %v2324_v23 = vmul.f32 %v2879_v20, %v2308_v41 }
 0x85c   :  { %v2332_v48 = vmul.f32 %v2594_v21, %v2324_v23 }
 0x85d   :  { %v2881_v24 = vpop.eup %2880 }
 0x85e   :  { %v2325_v22 = vmul.f32 %v2881_v24, %v2309_v63  ;;  %v2340_v32 = vadd.f32 %v2595_v30, %v2332_v48 }
 0x860   :  { %v2333_v31 = vmul.f32 %v2594_v21, %v2325_v22 }
 0x862   :  { %v2341_v60 = vadd.f32 %v2595_v30, %v2333_v31 }
 0x864   :  { %v2342_v33 = vpack.c.bf16 %v2341_v60, %v2340_v32 }
 0x866   :  { %2776 = vmatmul.mubr.msk.bf16.vlgmr.msra.gmra.mrb[40].mxu0 %vm54_vm0, %v2342_v33 }
 0x939   :  { %v2403_v18 = vpop.f32.mrb[40].mxu0 }
 0x93a   :  { %v2777_v45 = vpop.f32.mrb[41].mxu0  ;;  %v2404_v6 = vadd.f32 %v2596_v49, %v2403_v18 }
 0x93b   :  { %v2406_v28 = vpop.f32.mrb[42].mxu0 }
 0x93c   :  { %v2407_v14 = vadd.f32 %v2596_v49, %v2406_v28  ;;  %v2778_v19 = vpop.f32.mrb[43].mxu0 }
 0x93e   :  { %v2410_v2 = vpack.c.bf16 %v2407_v14, %v2404_v6 }
 0x940   :  { %v2411_v4 = vmul.bf16 %v2410_v2, %v2410_v2 }
 0x942   :  { %v2412_v46 = vmul.bf16 %v2411_v4, %v2410_v2 }
 0x944   :  { %v2413_v5 = vmul.bf16 1027030327, %v2412_v46 }
 0x946   :  { %v2414_v51 = vadd.bf16 %v2413_v5, %v2410_v2 }
 0x948   :  { %v2415_v47 = vmul.bf16 1061961548, %v2414_v51 }
 0x94a   :  { %2882 = vtanh.bf16 %v2415_v47 }
 0x955   :  { %v2883_v16 = vpop.eup %2882 }
 0x956   :  { %v2417_v15 = vadd.bf16 1065369472, %v2883_v16 }
 0x958   :  { %v2418_v17 = vmul.bf16 1056980736, %v2417_v15 }
 0x95a   :  { %v2419_v29 = vmul.bf16 %v2418_v17, %v2410_v2 }
 0x95c   :  { %2796 = vmatmul.mubr.bf16.vlgmr.msra.gmra.mrb[32].mxu1 %v2419_v29 }
 0xa2f   :  { %v2525_v40 = vpop.f32.mrb[32].mxu1 }
 0xa30   :  { %v2526_v27 = vadd.f32 %v2600_v26, %v2525_v40  ;;  %v2797_v53 = vpop.f32.mrb[33].mxu1 }
 0xa31   :  { %v2528_v54 = vpop.f32.mrb[34].mxu1 }
 0xa32   :  { %v2532_v55 = vadd.f32 %v2526_v27, %v3448_v52  ;;  %v2529_v38 = vadd.f32 %v2600_v26, %v2528_v54  ;;  %v2798_v58 = vpop.f32.mrb[35].mxu1 }
 0xa34   :  { %2534 = vst.msk [vmem:[#allocation2] sm:$0xff] %vm54_vm0, %v2532_v55  ;;  %v2533_v59 = vadd.f32 %v2529_v38, %v3453_v37 }
 0xa36   :  { %2535 = vst.msk [vmem:[#allocation2 + $0x8] sm:$0xff] %vm54_vm0, %v2533_v59 }
 0xa37   :  { %2897 = shalt.err (!%p2894_p4)
}
 0xa38   :  { %s2898_s19 = scalar_lea.hbm %s3544_s13, 256 }
 0xa39   :  { %p2899_p5 = scmp.ne.s32.totalorder %s3544_s13, %s2898_s19  ;;  %p2902_p6 = scmp.lt.u32.totalorder %s2898_s19, %s3544_s13 }
 0xa3b   :  { %p2904_p7 = pnand %p2902_p6, %p2899_p5 }
 0xa3d   :  { %2907 = shalt.err (!%p2904_p7)
}
 0xa3e   :  { %s2923_s21 = smov 128  }
 0xa3f   :  { %2547 = dma.vmem_to_hbm [thread:$0]  %s2542_s6, 256, %s3544_s13, [#allocation3], %s2923_s21, %s2923_s21, %s2920_s27  }
 0xa40   :  { %2908 = dma.done.wait [#allocation3], 256  }
 0xa41   :  { %2909 = vsyncadd [#allocation3], 4294967040 }
 0xa42   :  { %2551 = vsyncpa [#allocation3], 1 }

</bundles_post_ra>
